<compile_context>
chip_gen: v7x
topology: tpu7x:2x2x1
jax: 0.10.0
libtpu: 0.0.40
codegen_flags: <defaults>
</compile_context>

<pallas_src>
import jax
import jax.numpy as jnp
from jax.experimental import pallas as pl
from jax.experimental.pallas import tpu as pltpu


def _vmem_limit_bytes():
    """Derive a portable VMEM limit from the running chip (v7x has only 64 MiB)."""
    try:
        cap = int(pltpu.get_tpu_info().vmem_capacity_bytes)
    except Exception:
        cap = 64 * 1024 * 1024  # conservative: v7x per-TensorCore VMEM
    return max(32 * 1024 * 1024, min(cap * 3 // 4, 96 * 1024 * 1024))


def _make_conv_kernel(H, W, Cin):
    """Kernel for one (batch, output-depth-slice, depth-tap) grid step.

    x_ref     : (1, 1, P, Cin)      bf16 -- one zero-padded input plane, flattened
                                            in-plane (P = (H+2)*(W+2) + 2 tail zeros).
    w_ref     : (3, 9*Cin, Cout)    bf16 -- BN-scale-folded weights, tap-major K layout.
    shift_ref : (1, Cout)           f32  -- folded BN shift ((bias - mean)*scale + beta).
    o_ref     : (1, 1, L, Cout)          -- L = H*(W+2) rows (wrap columns dropped later).
    acc_ref   : (L, Cout) f32 VMEM scratch accumulator (lives across the kd axis).
    """
    Wp = W + 2
    L = H * Wp
    offsets = [kh * Wp + kw for kh in range(3) for kw in range(3)]  # t = kh*3 + kw

    def kernel(x_ref, w_ref, shift_ref, o_ref, acc_ref):
        kd = pl.program_id(2)

        x = x_ref[0, 0]                                     # (P, Cin) bf16, in VMEM
        # Nine shifted views of the same resident plane, folded into the contraction
        # dim -> single MXU matmul with M = L rows, K = 9*Cin.
        lhs = jnp.concatenate([x[o:o + L, :] for o in offsets], axis=-1)   # (L, 9*Cin)
        part = jnp.dot(lhs, w_ref[kd], preferred_element_type=jnp.float32)  # (L, Cout)

        @pl.when(kd == 0)
        def _():                       # first depth tap initializes the accumulator
            acc_ref[...] = part

        @pl.when(kd != 0)
        def _():
            acc_ref[...] = acc_ref[...] + part

        @pl.when(kd == pl.num_programs(2) - 1)
        def _():                       # fused BN shift + ReLU epilogue, all f32 (VPU)
            o_ref[0, 0] = jnp.maximum(acc_ref[...] + shift_ref[...], 0.0).astype(o_ref.dtype)

    return kernel, L


def conv3d_block(x, params, *, eps=1e-5, out_dtype=None):
    """Forward of Conv3DBlock: ReLU(BatchNorm3d(Conv3d(x, k=3, s=1, p=1))).

    x      : [B, Cin, D, H, W]  (PyTorch NCDHW layout)
    params : PyTorch-layout parameters (see init_params)
    returns: [B, Cout, D, H, W]
    """
    B, Cin, D, H, W = x.shape
    w = params["w"]                                   # (Cout, Cin, 3, 3, 3)
    Cout = w.shape[0]
    Wp = W + 2
    kernel, L = _make_conv_kernel(H, W, Cin)
    P = (H + 2) * Wp + 2        # +2 tail zeros so the largest tap offset (2*Wp+2)+L fits

    # ---- eval-mode BatchNorm3d + conv-bias fold into per-channel scale/shift -------
    # TODO(synk): training-mode BatchNorm (batch statistics + running-stat update) is
    # not implemented; eval-mode running statistics are used.
    scale = params["bn_g"] / jnp.sqrt(params["bn_var"] + eps)                 # (Cout,)
    shift = (params["b"] - params["bn_mean"]) * scale + params["bn_b"]        # (Cout,)
    shift2 = shift.reshape(1, Cout).astype(jnp.float32)

    # ---- weights: fold BN scale (f32), layout (kd, (kh*3+kw)*Cin + ci, Cout), bf16 --
    wk = (w.astype(jnp.float32) * scale[:, None, None, None, None])
    wk = jnp.transpose(wk, (2, 3, 4, 1, 0)).reshape(3, 9 * Cin, Cout)
    wk = wk.astype(jnp.bfloat16)

    # ---- input: NCDHW -> NDHWC, zero-pad, flatten in-plane dims, +2 tail zeros ------
    xt = jnp.transpose(x, (0, 2, 3, 4, 1))                                    # (B,D,H,W,Cin)
    xp = jnp.pad(xt, ((0, 0), (1, 1), (1, 1), (1, 1), (0, 0)))                # (B,D+2,H+2,Wp,Cin)
    xf = xp.reshape(B, D + 2, (H + 2) * Wp, Cin)
    xf = jnp.pad(xf, ((0, 0), (0, 0), (0, P - (H + 2) * Wp), (0, 0)))
    xf = xf.astype(jnp.bfloat16)                                              # (B,D+2,P,Cin)

    out_dtype = x.dtype if out_dtype is None else out_dtype

    out = pl.pallas_call(
        kernel,
        out_shape=jax.ShapeDtypeStruct((B, D, L, Cout), out_dtype),
        grid=(B, D, 3),
        in_specs=[
            # one padded depth plane per step: plane (d + kd) of the padded volume
            pl.BlockSpec((1, 1, P, Cin), lambda b, d, kd: (b, d + kd, 0, 0)),
            # full (tiny) weight tensor, resident in VMEM for the whole grid
            pl.BlockSpec((3, 9 * Cin, Cout), lambda b, d, kd: (0, 0, 0)),
            pl.BlockSpec((1, Cout), lambda b, d, kd: (0, 0)),
        ],
        # output index ignores kd -> block stays resident across the reduction axis
        out_specs=pl.BlockSpec((1, 1, L, Cout), lambda b, d, kd: (b, d, 0, 0)),
        scratch_shapes=[pltpu.VMEM((L, Cout), jnp.float32)],
        compiler_params=pltpu.CompilerParams(
            dimension_semantics=("parallel", "parallel", "arbitrary"),
            vmem_limit_bytes=_vmem_limit_bytes(),
        ),
    )(xf, wk, shift2)

    # (B, D, H*(W+2), Cout): drop the 2 wrap columns per row, back to NCDHW.
    out = out.reshape(B, D, H, Wp, Cout)[:, :, :, :W, :]
    return jnp.transpose(out, (0, 4, 1, 2, 3))


conv3d_block = jax.jit(conv3d_block, static_argnames=("eps", "out_dtype"))


def conv3d_block_ref(x, params, eps=1e-5):
    """Pure-JAX reference (f32) for correctness checking."""
    w = params["w"].astype(jnp.float32)
    y = jax.lax.conv_general_dilated(
        x.astype(jnp.float32), w,
        window_strides=(1, 1, 1),
        padding=((1, 1), (1, 1), (1, 1)),
        dimension_numbers=("NCDHW", "OIDHW", "NCDHW"),
    )
    Cout = w.shape[0]
    y = y + params["b"].reshape(1, Cout, 1, 1, 1)
    s = (params["bn_g"] / jnp.sqrt(params["bn_var"] + eps)).reshape(1, Cout, 1, 1, 1)
    y = (y - params["bn_mean"].reshape(1, Cout, 1, 1, 1)) * s \
        + params["bn_b"].reshape(1, Cout, 1, 1, 1)
    return jnp.maximum(y, 0.0)


def init_params(key, cin, cout):
    k = jax.random.split(key, 6)
    return {
        # PyTorch layouts: Conv3d weight [Cout, Cin, 3, 3, 3], bias [Cout]
        "w": 0.1 * jax.random.normal(k[0], (cout, cin, 3, 3, 3), jnp.float32),
        "b": 0.1 * jax.random.normal(k[1], (cout,), jnp.float32),
        # BatchNorm3d eval-mode parameters / running statistics
        "bn_g": 1.0 + 0.1 * jax.random.normal(k[2], (cout,), jnp.float32),
        "bn_b": 0.1 * jax.random.normal(k[3], (cout,), jnp.float32),
        "bn_mean": 0.1 * jax.random.normal(k[4], (cout,), jnp.float32),
        "bn_var": jnp.abs(1.0 + 0.1 * jax.random.normal(k[5], (cout,), jnp.float32)),
    }


if __name__ == "__main__":
    # Small shapes consistent with the module: [B, C, D, H, W]
    B, Cin, Cout, D, H, W = 2, 4, 16, 16, 16, 16

    key = jax.random.PRNGKey(0)
    kx, kp = jax.random.split(key)
    x = jax.random.normal(kx, (B, Cin, D, H, W), jnp.float32)
    params = init_params(kp, Cin, Cout)

    out = conv3d_block(x, params)
    out = jax.block_until_ready(out)
    assert out.shape == (B, Cout, D, H, W)

    ref = conv3d_block_ref(x, params)
    err = float(jnp.max(jnp.abs(out - ref)))
    # bf16 matmul operands (BN scale folded into weights), f32 accumulation.
    assert err < 1e-1, f"max abs err {err}"

    print("KERNEL_OK")
</pallas_src>

<mosaic_0001>
module attributes {stable_mosaic.version = 11 : i64} {
  func.func @kernel(%arg0: i32, %arg1: i32, %arg2: i32, %arg3: memref<1x1x326x4xbf16, #tpu.memory_space<vmem>>, %arg4: memref<3x36x16xbf16, #tpu.memory_space<vmem>>, %arg5: memref<1x16xf32, #tpu.memory_space<vmem>>, %arg6: memref<1x1x288x16xf32, #tpu.memory_space<vmem>>, %arg7: memref<288x16xf32, #tpu.memory_space<vmem>>) attributes {dimension_semantics = [#tpu.dimension_semantics<parallel>, #tpu.dimension_semantics<parallel>, #tpu.dimension_semantics<arbitrary>], iteration_bounds = array<i64: 2, 16, 3>, scalar_prefetch = 0 : i64, scratch_operands = 1 : i64, tpu.core_type = #tpu.core_type<tc>, window_params = [{transform_indices = @transform_0, window_bounds = array<i64: 1, 1, 326, 4>}, {pipeline_mode = #tpu.pipeline_mode<synchronous>, transform_indices = @transform_1, window_bounds = array<i64: 3, 36, 16>}, {pipeline_mode = #tpu.pipeline_mode<synchronous>, transform_indices = @transform_2, window_bounds = array<i64: 1, 16>}, {transform_indices = @transform_3, window_bounds = array<i64: 1, 1, 288, 16>}]} {
    %c0 = arith.constant 0 : index
    %c0_0 = arith.constant 0 : index
    %c0_1 = arith.constant 0 : index
    %c0_2 = arith.constant 0 : index
    %0 = vector.load %arg3[%c0, %c0_0, %c0_1, %c0_2] : memref<1x1x326x4xbf16, #tpu.memory_space<vmem>>, vector<1x1x326x4xbf16>
    %1 = vector.shape_cast %0 : vector<1x1x326x4xbf16> to vector<326x4xbf16>
    %2 = vector.extract_strided_slice %1 {offsets = [0, 0], sizes = [288, 4], strides = [1, 1]} : vector<326x4xbf16> to vector<288x4xbf16>
    %3 = vector.extract_strided_slice %1 {offsets = [1, 0], sizes = [288, 4], strides = [1, 1]} : vector<326x4xbf16> to vector<288x4xbf16>
    %4 = vector.extract_strided_slice %1 {offsets = [2, 0], sizes = [288, 4], strides = [1, 1]} : vector<326x4xbf16> to vector<288x4xbf16>
    %5 = vector.extract_strided_slice %1 {offsets = [18, 0], sizes = [288, 4], strides = [1, 1]} : vector<326x4xbf16> to vector<288x4xbf16>
    %6 = vector.extract_strided_slice %1 {offsets = [19, 0], sizes = [288, 4], strides = [1, 1]} : vector<326x4xbf16> to vector<288x4xbf16>
    %7 = vector.extract_strided_slice %1 {offsets = [20, 0], sizes = [288, 4], strides = [1, 1]} : vector<326x4xbf16> to vector<288x4xbf16>
    %8 = vector.extract_strided_slice %1 {offsets = [36, 0], sizes = [288, 4], strides = [1, 1]} : vector<326x4xbf16> to vector<288x4xbf16>
    %9 = vector.extract_strided_slice %1 {offsets = [37, 0], sizes = [288, 4], strides = [1, 1]} : vector<326x4xbf16> to vector<288x4xbf16>
    %10 = vector.extract_strided_slice %1 {offsets = [38, 0], sizes = [288, 4], strides = [1, 1]} : vector<326x4xbf16> to vector<288x4xbf16>
    %11 = tpu.concatenate %2, %3, %4, %5, %6, %7, %8, %9, %10 in 1 : vector<288x4xbf16>, vector<288x4xbf16>, vector<288x4xbf16>, vector<288x4xbf16>, vector<288x4xbf16>, vector<288x4xbf16>, vector<288x4xbf16>, vector<288x4xbf16>, vector<288x4xbf16> -> vector<288x36xbf16>
    %12 = arith.index_cast %arg2 : i32 to index
    %c0_3 = arith.constant 0 : index
    %c0_4 = arith.constant 0 : index
    %13 = vector.load %arg4[%12, %c0_3, %c0_4] : memref<3x36x16xbf16, #tpu.memory_space<vmem>>, vector<1x36x16xbf16>
    %14 = vector.shape_cast %13 : vector<1x36x16xbf16> to vector<36x16xbf16>
    %cst = arith.constant dense<0.000000e+00> : vector<288x16xf32>
    %15 = tpu.matmul %11, %14, %cst {dimension_numbers = #tpu.dot_dimension_numbers<[1], [0], [0], [1], [0, 0, 1, 1], [], []>} : vector<288x36xbf16>, vector<36x16xbf16>, vector<288x16xf32> -> vector<288x16xf32>
    %c0_i32 = arith.constant 0 : i32
    %16 = arith.cmpi eq, %arg2, %c0_i32 : i32
    %17 = arith.extui %16 : i1 to i32
    %c0_i32_5 = arith.constant 0 : i32
    %18 = arith.cmpi ne, %17, %c0_i32_5 : i32
    scf.if %18 {
      %c0_9 = arith.constant 0 : index
      %c0_10 = arith.constant 0 : index
      %25 = vector.load %arg7[%c0_9, %c0_10] : memref<288x16xf32, #tpu.memory_space<vmem>>, vector<288x16xf32>
      tpu.vector_store %arg7[%c0_9, %c0_10], %15 {strides = array<i32>} : memref<288x16xf32, #tpu.memory_space<vmem>>, vector<288x16xf32>,
    } else {
    }
    %c0_i32_6 = arith.constant 0 : i32
    %19 = arith.cmpi ne, %arg2, %c0_i32_6 : i32
    %20 = arith.extui %19 : i1 to i32
    %c0_i32_7 = arith.constant 0 : i32
    %21 = arith.cmpi ne, %20, %c0_i32_7 : i32
    scf.if %21 {
      %c0_9 = arith.constant 0 : index
      %c0_10 = arith.constant 0 : index
      %25 = vector.load %arg7[%c0_9, %c0_10] : memref<288x16xf32, #tpu.memory_space<vmem>>, vector<288x16xf32>
      %26 = arith.addf %25, %15 : vector<288x16xf32>
      %c0_11 = arith.constant 0 : index
      %c0_12 = arith.constant 0 : index
      %27 = vector.load %arg7[%c0_11, %c0_12] : memref<288x16xf32, #tpu.memory_space<vmem>>, vector<288x16xf32>
      tpu.vector_store %arg7[%c0_11, %c0_12], %26 {strides = array<i32>} : memref<288x16xf32, #tpu.memory_space<vmem>>, vector<288x16xf32>,
    } else {
    }
    %c2_i32 = arith.constant 2 : i32
    %22 = arith.cmpi eq, %arg2, %c2_i32 : i32
    %23 = arith.extui %22 : i1 to i32
    %c0_i32_8 = arith.constant 0 : i32
    %24 = arith.cmpi ne, %23, %c0_i32_8 : i32
    scf.if %24 {
      %c0_9 = arith.constant 0 : index
      %c0_10 = arith.constant 0 : index
      %25 = vector.load %arg7[%c0_9, %c0_10] : memref<288x16xf32, #tpu.memory_space<vmem>>, vector<288x16xf32>
      %c0_11 = arith.constant 0 : index
      %c0_12 = arith.constant 0 : index
      %26 = vector.load %arg5[%c0_11, %c0_12] : memref<1x16xf32, #tpu.memory_space<vmem>>, vector<1x16xf32>
      %27 = vector.broadcast %26 : vector<1x16xf32> to vector<288x16xf32>
      %28 = arith.addf %25, %27 : vector<288x16xf32>
      %cst_13 = arith.constant 0.000000e+00 : f32
      %29 = vector.broadcast %cst_13 : f32 to vector<288x16xf32>
      %30 = arith.maximumf %28, %29 : vector<288x16xf32>
      %c0_14 = arith.constant 0 : index
      %c0_15 = arith.constant 0 : index
      %c0_16 = arith.constant 0 : index
      %c0_17 = arith.constant 0 : index
      %31 = vector.load %arg6[%c0_14, %c0_15, %c0_16, %c0_17] : memref<1x1x288x16xf32, #tpu.memory_space<vmem>>, vector<1x1x288x16xf32>
      %32 = vector.shape_cast %31 : vector<1x1x288x16xf32> to vector<288x16xf32>
      %33 = vector.shape_cast %30 : vector<288x16xf32> to vector<1x1x288x16xf32>
      tpu.vector_store %arg6[%c0_14, %c0_15, %c0_16, %c0_17], %33 {strides = array<i32>} : memref<1x1x288x16xf32, #tpu.memory_space<vmem>>, vector<1x1x288x16xf32>,
    } else {
    }
    return
  }
  func.func @transform_0(%arg0: i32, %arg1: i32, %arg2: i32) -> (i32, i32, i32, i32) {
    %0 = arith.addi %arg1, %arg2 : i32
    %c0_i32 = arith.constant 0 : i32
    %c0_i32_0 = arith.constant 0 : i32
    %c0_i32_1 = arith.constant 0 : i32
    return %arg0, %0, %c0_i32, %c0_i32_0 : i32, i32, i32, i32
  }
  func.func @transform_1(%arg0: i32, %arg1: i32, %arg2: i32) -> (i32, i32, i32) {
    %c0_i32 = arith.constant 0 : i32
    %c0_i32_0 = arith.constant 0 : i32
    %c0_i32_1 = arith.constant 0 : i32
    %c0_i32_2 = arith.constant 0 : i32
    return %c0_i32, %c0_i32_0, %c0_i32_1 : i32, i32, i32
  }
  func.func @transform_2(%arg0: i32, %arg1: i32, %arg2: i32) -> (i32, i32) {
    %c0_i32 = arith.constant 0 : i32
    %c0_i32_0 = arith.constant 0 : i32
    %c0_i32_1 = arith.constant 0 : i32
    return %c0_i32, %c0_i32_0 : i32, i32
  }
  func.func @transform_3(%arg0: i32, %arg1: i32, %arg2: i32) -> (i32, i32, i32, i32) {
    %c0_i32 = arith.constant 0 : i32
    %c0_i32_0 = arith.constant 0 : i32
    %c0_i32_1 = arith.constant 0 : i32
    return %arg0, %arg1, %c0_i32, %c0_i32_0 : i32, i32, i32, i32
  }
}

</mosaic_0001>

<bundles_post_ra>
// kernel: conv3d_block.1
= control target key start
LH: loop header
LB: loop body
LE: loop exit
PB: predicated region body
PF: predicated region fallthrough
CT: control target
= control target key end

     0   :  { %s2368_s12 = smov 0   ;;  %s2370_s13 = smov 0   ;;  %s3939_s0 = inlined_call_operand.vmem [shape: bf16[2,18,326,4], index: 0, kind: input, shape index: {}]   ;;  %s3940_s1 = inlined_call_operand.vmem [shape: bf16[3,36,16], index: 1, kind: input, shape index: {}]   ;;  %s3941_s2 = inlined_call_operand.vmem [shape: f32[1,16], index: 2, kind: input, shape index: {}]   ;;  %s3942_s3 = inlined_call_operand.vmem [shape: f32[2,16,288,16], index: 3, kind: output, shape index: {}]  }
   0x1   :  { %s2372_s14 = smov 0   ;;  %s2374_s15 = smov 0  }
   0x2   :  { %s2376_s16 = smov 0   ;;  %s2378_s17 = smov 0  }
   0x3   :  { %s2380_s18 = smov 0  }
   0x4 LB: > { %s25_s19 = sadd.s32 1, %s2326_s15  ;;  %s28_s20 = sadd.s32 1, %s2330_s16  ;;  %s2338_s18 = sphi %s2380_s18, %s13_s18   ;;  %s2334_s17 = sphi %s2378_s17, %s4008_s17   ;;  %s2330_s16 = sphi %s2376_s16, %s4007_s16   ;;  %s2326_s15 = sphi %s2374_s15, %s4006_s15   ;;  %s2322_s14 = sphi %s2372_s14, %s4005_s14   ;;  %s2318_s13 = sphi %s2370_s13, %s4004_s13   ;;  %s2314_s12 = sphi %s2368_s12, %s4003_s12  }
   0x5   : > { %p26_p0 = scmp.ge.s32.totalorder %s25_s19, 3  ;;  %p2050_p1 = scmp.ge.s32.totalorder %s2338_s18, 1 }
   0x6   : > { %p168_p2 = scmp.lt.s32.totalorder %s2338_s18, 97  ;;  %s32_s21 = sadd.s32 1, %s2334_s17 }
   0x7   : > { %s4010_s19 = smov (%p26_p0, %s25_s19), 0  ;;  %s4012_s20 = smov (!%p26_p0, %s28_s20), %s2330_s16 }
   0x8   : > { %p169_p3 = pnand %p2050_p1, %p168_p2  ;;  %p30_p4 = scmp.ge.s32.totalorder %s4012_s20, 16 }
   0xa   : > { %s4014_s20 = smov (%p30_p4, %s4012_s20), 0  ;;  %s4016_s21 = smov (!%p30_p4, %s32_s21), %s2334_s17 }
   0xb   : > { %p34_p5 = scmp.ge.s32.totalorder %s4016_s21, 2  ;;  %172 = sbr.rel (%p169_p3) target bundleno = 695 (0x2b7), region = 32 }
   0xd   : > { %s4018_s21 = smov (%p34_p5, %s4016_s21), 0 }
  0x12   : > { %s201_s22 = sadd.s32 %s2314_s12, %s2318_s13  ;;  %p202_p6 = scmp.lt.s32.totalorder %s2322_s14, 1  ;;  %vm541_vm0 = vcmask 1046528   ;;  %vm783_vm1 = vcmask 1045504   ;;  %vm356_vm2 = vsmask.f32 7424  ;;  %vm1025_vm5 = vcmask 1044480  }
  0x13   : > { %p204_p7 = scmp.lt.s32.totalorder %s201_s22, 17  ;;  %p214_p8 = scmp.lt.s32.totalorder %s2318_s13, 15  ;;  %vm661_vm3 = vsmask.f32 6400  ;;  %vm903_vm4 = vsmask.f32 5376 }
  0x14   : > { %s4020_s14 = smov (!%p202_p6, %s2322_s14), 1  ;;  %s2340_s10 = smov 12   ;;  %vm1455_vm6 = vcmask 1041408   ;;  %vm1099_vm7 = vcmask 31744   ;;  %vm1136_vm8 = vcmask 64512   ;;  %vm1173_vm9 = vcmask 97280  }
  0x15   : > { %s4022_s22 = smov (!%p204_p7, %s201_s22), 17  ;;  %s2177_s23 = smul.u32 738, %s4020_s14  ;;  %vm1210_vm10 = vcmask 130048   ;;  %vm1247_vm11 = vcmask 162816   ;;  %vm1284_vm12 = vcmask 195584   ;;  %vm1321_vm13 = vcmask 228352  }
  0x16   : > { %s2176_s24 = smul.u32 41, %s4022_s22  ;;  %s4024_s13 = smov (!%p214_p8, %s2318_s13), 15  ;;  %vm1358_vm14 = vcmask 261120   ;;  %vm1418_vm15 = vcmask 293888  }
  0x17   : > { %s2179_s26 = smul.u32 576, %s4020_s14  ;;  %s2341_s11 = smov 8  }
  0x18   : > { %s208_s25 = sadd.s32 %s2177_s23, %s2176_s24  ;;  %s2178_s28 = smul.u32 36, %s4024_s13 }
  0x19   : > { %s2051_s27 = sshll.u32 %s208_s25, 2  ;;  %s2342_s13 = smov 20  }
  0x1a   : > { %s2416_s4 = scalar_lea.vmem %s3939_s0, %s2051_s27  ;;  %s218_s5 = sadd.s32 %s2179_s26, %s2178_s28 }
  0x1b   : > { %s2052_s6 = sshll.u32 %s218_s5, 3  ;;  %v2419_v0 = vld [vmem:[%s2416_s4 + $0x8] sm:$0xff]   ;;  %v2422_v1 = vld [vmem:[%s2416_s4 + $0x10] sm:$0xff]   ;;  %v2430_v2 = vld [vmem:[%s2416_s4] sm:$0xff]   ;;  %s2343_s14 = smov 24  }
  0x1c   : > { %s2427_s9 = scalar_lea.vmem %s3942_s3, %s2052_s6  ;;  %v543_v3 = vrot.slane %v2419_v0, 1  ;;  %v545_v4 = vrot.slane %v2422_v1, 1  ;;  %v784_v5 = vrot.slane %v2419_v0, 2  ;;  %v785_v6 = vrot.slane %v2422_v1, 2  ;;  %v2438_v8 = vld [vmem:[%s2416_s4 + $0x18] sm:$0xff]   ;;  %v2450_v17 = vld [vmem:[%s2416_s4 + $0x20] sm:$0xff]  }
  0x1d   : > { %v542_v7 = vrot.slane %v2430_v2, 1  ;;  %v360_v9 = vshll.u32 %v2430_v2, 16  ;;  %v358_v12 = vshrl.u32 %v2430_v2, 16  ;;  %v787_v14 = vrot.slane %v2438_v8, 2  ;;  %s2104_s22 = smul.u32 20, %s2314_s12  ;;  %v2492_v40 = vld [vmem:[%s2416_s4 + $0x50] sm:$0xff]  }
  0x1e   : > { %v546_v10 = vsel %vm541_vm0, %v543_v3, %v545_v4  ;;  %v786_v13 = vsel %vm783_vm1, %v784_v5, %v785_v6  ;;  %v365_v16 = vshll.u32 %v2419_v0, 16  ;;  %v547_v18 = vrot.slane %v2438_v8, 1  ;;  %s2344_s23 = smov 4   ;;  %v2522_v57 = vld [vmem:[%s2416_s4 + $0x58] sm:$0xff]   ;;  %s2345_s27 = smov 16  }
  0x1f   : > { %625 = vrot.lane.b32.xlu0 %v546_v10, %s2340_s10  ;;  %v544_v11 = vsel %vm541_vm0, %v542_v7, %v543_v3  ;;  %v362_v15 = vrot.slane %v360_v9, 1  ;;  %v369_v19 = vshrl.u32 %v2419_v0, 16  ;;  %v2455_v20 = vshll.u32 %v2422_v1, 16  ;;  %s2501_s26 = scalar_lea.vmem %s3940_s1, %s2104_s22  ;;  %v2548_v9 = vld [vmem:[%s2416_s4 + $0x60] sm:$0xff]   ;;  %s2346_s28 = smov 28  }
  0x20   : > { %579 = vrot.lane.b32.xlu1 %v544_v11, %s2341_s11  ;;  %v2458_v21 = vshrl.u32 %v2422_v1, 16  ;;  %v2462_v22 = vshll.u32 %v2438_v8, 16  ;;  %v788_v23 = vsel %vm783_vm1, %v785_v6, %v787_v14  ;;  %v367_v25 = vrot.slane %v365_v16, 1  ;;  %v2258_v52 = vld [vmem:[%s2501_s26] sm:$0xff]   ;;  %v2259_v53 = vld [vmem:[%s2501_s26 + $0x8] sm:$0xff]   ;;  %3968 = vst [vmem:[#allocation4_spill] sm:$0xff] %v2548_v9 }
  0x21   : > { %v363_v24 = vor.u32 %v362_v15, %v358_v12  ;;  %v2467_v26 = vshrl.u32 %v2438_v8, 16  ;;  %v2472_v27 = vsel %vm541_vm0, %v545_v4, %v547_v18  ;;  %v789_v28 = vrot.slane %v2450_v17, 2  ;;  %2126 = vmatprep.subr.bf16.mxu0 %v2258_v52  ;;  %2168 = vmatprep.subr.bf16.mxu1 %v2258_v52  ;;  %s2347_s29 = smov 32   ;;  %p2098_p9 = scmp.ne.s32.totalorder %s2314_s12, 0 }
  0x22   : > { %v371_v29 = vor.u32 %v369_v19, %v367_v25  ;;  %v375_v30 = vrot.slane %v2455_v20, 1  ;;  %v665_v31 = vrot.slane %v2458_v21, 1  ;;  %v666_v32 = vrot.slane %v2455_v20, 2  ;;  %2127 = vmatpush3.bf16.msra.mxu0 %v2258_v52  ;;  %2171 = vmatpush3.bf16.msra.mxu1 %v2258_v52 }
  0x23   : > { %821 = vrot.lane.b32.xlu0 %v786_v13, %s2342_s13  ;;  %v670_v33 = vrot.slane %v2462_v22, 2  ;;  %v662_v34 = vrot.slane %v369_v19, 1  ;;  %v663_v35 = vrot.slane %v365_v16, 2  ;;  %v368_v36 = vsel %vm356_vm2, %v363_v24, %v367_v25  ;;  %2128 = vmatprep.subr.bf16.mxu0 %v2259_v53 }
  0x24   : > { %581 = vrot.lane.b32.xlu1 %v546_v10, %s2341_s11  ;;  %v669_v37 = vrot.slane %v2467_v26, 1  ;;  %v2485_v38 = vshll.u32 %v2450_v17, 16  ;;  %v2488_v39 = vshrl.u32 %v2450_v17, 16  ;;  %v376_v41 = vsel %vm356_vm2, %v371_v29, %v375_v30  ;;  %2169 = vmatprep.subr.bf16.mxu1 %v2259_v53 }
  0x25   : > { %v907_v42 = vrot.slane %v2467_v26, 2  ;;  %v908_v43 = vrot.slane %v2462_v22, 3  ;;  %v667_v44 = vor.u32 %v666_v32, %v665_v31  ;;  %v664_v45 = vor.u32 %v663_v35, %v662_v34  ;;  %v2595_v34 = vld [vmem:[%s2416_s4 + $0x68] sm:$0xff]  }
  0x26   : > { %v904_v46 = vrot.slane %v2458_v21, 2  ;;  %v905_v47 = vrot.slane %v2455_v20, 3  ;;  %v2509_v48 = vsel %vm783_vm1, %v787_v14, %v789_v28  ;;  %v2511_v49 = vor.u32 %v670_v33, %v669_v37  ;;  %2129 = vmatpush3.bf16.msra.mxu0 %v2259_v53  ;;  %2172 = vmatpush3.bf16.msra.mxu1 %v2259_v53  ;;  %v2600_v35 = vld [vmem:[%s2416_s4 + $0x28] sm:$0xff]   ;;  %v2262_v53 = vld [vmem:[%s2501_s26 + $0x10] ss:$0 sps:$4 sm:$0x33]  }
  0x27   : > { %867 = vrot.lane.b32.xlu0 %v788_v23, %s2343_s14  ;;  %v911_v50 = vrot.slane %v2488_v39, 2  ;;  %v912_v51 = vrot.slane %v2485_v38, 3  ;;  %v668_v54 = vsel %vm661_vm3, %v664_v45, %v667_v44  ;;  %v909_v55 = vor.u32 %v908_v43, %v907_v42  ;;  %2174 = vmatprep.subr.msk.bf16.mxu0 %vm1455_vm6, %v2262_v53 }
  0x28   : > { %627 = vrot.lane.b32.xlu1 %v2472_v27, %s2340_s10  ;;  %v906_v56 = vor.u32 %v905_v47, %v904_v46  ;;  %v2525_v58 = vshll.u32 %v2492_v40, 16  ;;  %v672_v59 = vsel %vm661_vm3, %v667_v44, %v2511_v49  ;;  %v1026_v61 = vrot.slane %v2422_v1, 3  ;;  %2175 = vmatprep.subr.msk.bf16.mxu1 %vm1455_vm6, %v2262_v53 }
  0x29   : > { %v2529_v60 = vor.u32 %v912_v51, %v911_v50  ;;  %v1027_v62 = vrot.slane %v2438_v8, 3  ;;  %v2538_v4 = vshrl.u32 %v2492_v40, 16  ;;  %v2541_v5 = vshll.u32 %v2522_v57, 16 }
  0x2a   : > { %v910_v63 = vsel %vm903_vm4, %v906_v56, %v909_v55  ;;  %v3946_v3 = vrot.slane %v2525_v58, 1  ;;  %v379_v1 = vor.u32 %v2458_v21, %v375_v30  ;;  %v383_v7 = vrot.slane %v2462_v22, 1 }
  0x2b   : > { %505 = vrot.lane.b32.xlu0 %v368_v36, %s2344_s23  ;;  %3967 = vst [vmem:[#allocation3_spill] sm:$0xff] %v2541_v5  ;;  %v914_v6 = vsel %vm903_vm4, %v909_v55, %v2529_v60  ;;  %v1028_v10 = vsel %vm1025_vm5, %v1026_v61, %v1027_v62  ;;  %v447_v12 = vrot.slane %v2541_v5, 1  ;;  %v1029_v14 = vrot.slane %v2450_v17, 3 }
  0x2c   : > { %823 = vrot.lane.b32.xlu1 %v788_v23, %s2342_s13  ;;  %v443_v11 = vor.u32 %v2538_v4, %v3946_v3  ;;  %v384_v13 = vsel %vm356_vm2, %v379_v1, %v383_v7  ;;  %v2560_v15 = vshrl.u32 %v2522_v57, 16  ;;  %v2563_v16 = vshll.u32 %v2548_v9, 16 }
  0x2d   : > { %v387_v20 = vor.u32 %v2467_v26, %v383_v7  ;;  %v391_v21 = vrot.slane %v2485_v38, 1  ;;  %v1030_v22 = vsel %vm1025_vm5, %v1027_v62, %v1029_v14  ;;  %v3945_v29 = vrot.slane %v2492_v40, 1 }
  0x2e   : > { %3969 = vst [vmem:[#allocation5_spill] sm:$0xff] %v2560_v15  ;;  %v448_v19 = vsel %vm356_vm2, %v443_v11, %v447_v12  ;;  %v451_v23 = vor.u32 %v2560_v15, %v447_v12  ;;  %v455_v24 = vrot.slane %v2563_v16, 1  ;;  %v563_v30 = vrot.slane %v2522_v57, 1 }
  0x2f   : > { %507 = vrot.lane.b32.xlu0 %v376_v41, %s2344_s23  ;;  %v392_v25 = vsel %vm356_vm2, %v387_v20, %v391_v21  ;;  %v549_v31 = vrot.slane %v2450_v17, 1  ;;  %v565_v33 = vrot.slane %v2548_v9, 1  ;;  %v2609_v41 = vshrl.u32 %v2548_v9, 16 }
  0x30   : > { %869 = vrot.lane.b32.xlu1 %v2509_v48, %s2343_s14  ;;  %v456_v26 = vsel %vm356_vm2, %v451_v23, %v455_v24  ;;  %v2591_v32 = vsel %vm541_vm0, %v3945_v29, %v563_v30  ;;  %v567_v42 = vrot.slane %v2595_v34, 1  ;;  %v701_v43 = vrot.slane %v2560_v15, 1  ;;  %v2270_v15 = vld [vmem:[%s2416_s4 + $0x10] sm:$0xff]  }
  0x31   : > { %3970 = vst [vmem:[#allocation6_spill] sm:$0xff] %v2591_v32  ;;  %v550_v36 = vsel %vm541_vm0, %v547_v18, %v549_v31  ;;  %v566_v37 = vsel %vm541_vm0, %v563_v30, %v565_v33  ;;  %v702_v44 = vrot.slane %v2541_v5, 2  ;;  %v706_v8 = vrot.slane %v2563_v16, 2  ;;  %v2684_v30 = vld [vmem:[%s2416_s4 + $0x70] sm:$0xff]  }
  0x32   : > { %v673_v18 = vrot.slane %v2488_v39, 1  ;;  %v674_v45 = vrot.slane %v2485_v38, 2  ;;  %v2621_v46 = vshll.u32 %v2600_v35, 16  ;;  %v2624_v47 = vshrl.u32 %v2600_v35, 16 }
  0x33   : > { %747 = vrot.lane.b32.xlu0 %v668_v54, %s2345_s27  ;;  %v705_v50 = vrot.slane %v2609_v41, 1  ;;  %v2628_v51 = vshll.u32 %v2595_v34, 16  ;;  %v2631_v52 = vshrl.u32 %v2595_v34, 16  ;;  %v2638_v54 = vsel %vm541_vm0, %v565_v33, %v567_v42 }
  0x34   : > { %749 = vrot.lane.b32.xlu1 %v672_v59, %s2345_s27  ;;  %v675_v56 = vor.u32 %v674_v45, %v673_v18  ;;  %v677_v59 = vrot.slane %v2624_v47, 1  ;;  %v678_v61 = vrot.slane %v2621_v46, 2  ;;  %v2648_v62 = vor.u32 %v702_v44, %v701_v43 }
  0x35   : > { %v710_v1 = vrot.slane %v2628_v51, 2  ;;  %v1457_v7 = vsel %vm1455_vm6, %v2262_v53, 0  ;;  %v3944_v20 = vrot.slane %v2522_v57, 2  ;;  %v791_v23 = vrot.slane %v2600_v35, 2 }
  0x36   : > { %3971 = vst [vmem:[#allocation7_spill] sm:$0xff] %v2648_v62  ;;  %2131 = vmatpush3.bf16.msra.mxu0 %v1457_v7  ;;  %v2658_v11 = vor.u32 %v678_v61, %v677_v59  ;;  %2173 = vmatpush3.bf16.msra.mxu1 %v1457_v7  ;;  %v944_v44 = vrot.slane %v2563_v16, 3  ;;  %v916_v18 = vrot.slane %v2621_v46, 3  ;;  %v948_v53 = vrot.slane %v2628_v51, 3 }
  0x37   : > { %989 = vrot.lane.b32.xlu0 %v910_v63, %s2346_s28  ;;  %v707_v63 = vor.u32 %v706_v8, %v705_v50  ;;  %v792_v33 = vsel %vm783_vm1, %v789_v28, %v791_v23  ;;  %v915_v8 = vrot.slane %v2624_v47, 2  ;;  %v947_v50 = vrot.slane %v2631_v52, 2 }
  0x38   : > { %991 = vrot.lane.b32.xlu1 %v914_v6, %s2346_s28  ;;  %v709_v6 = vrot.slane %v2631_v52, 1  ;;  %v2715_v59 = vshrl.u32 %v2684_v30, 16 }
  0x39   : > { %v708_v12 = vsel %vm661_vm3, %v2648_v62, %v707_v63 }
  0x3b   : > { %1063 = vrot.lane.b32.xlu0 %v1028_v10, %s2347_s29  ;;  %v676_v10 = vsel %vm661_vm3, %v2511_v49, %v675_v56 }
  0x3c   : > { %509 = vrot.lane.b32.xlu1 %v384_v13, %s2344_s23  ;;  %v2662_v13 = vor.u32 %v710_v1, %v709_v6  ;;  %v917_v6 = vor.u32 %v916_v18, %v915_v8  ;;  %v1047_v8 = vrot.slane %v2595_v34, 3 }
  0x3e   : > { %v712_v49 = vsel %vm661_vm3, %v707_v63, %v2662_v13 }
  0x3f   : > { %525 = vrot.lane.b32.xlu0 %v448_v19, %s2344_s23  ;;  %v680_v19 = vsel %vm661_vm3, %v675_v56, %v2658_v11  ;;  %v2712_v56 = vshll.u32 %v2684_v30, 16 }
  0x40   : > { %1065 = vrot.lane.b32.xlu1 %v1030_v22, %s2347_s29  ;;  %v805_v22 = vrot.slane %v2548_v9, 2 }
  0x43   : > { %511 = vrot.lane.b32.xlu0 %v392_v25, %s2344_s23  ;;  %v2678_v25 = vsel %vm783_vm1, %v3944_v20, %v805_v22 }
  0x44   : > { %527 = vrot.lane.b32.xlu1 %v456_v26, %s2344_s23  ;;  %3972 = vst [vmem:[#allocation8_spill] sm:$0xff] %v2678_v25  ;;  %v807_v26 = vrot.slane %v2595_v34, 2  ;;  %v713_v34 = vrot.slane %v2715_v59, 1 }
  0x47   : > { %583 = vrot.lane.b32.xlu0 %v2472_v27, %s2341_s11  ;;  %v551_v27 = vrot.slane %v2600_v35, 1 }
  0x48   : > { %599 = vrot.lane.b32.xlu1 %v2591_v32, %s2341_s11 }
  0x49   : > { %v2643_v55 = vsel %vm541_vm0, %v549_v31, %v551_v27  ;;  %v2687_v31 = vld [vmem:[%s2416_s4 + $0x30] sm:$0xff]  }
  0x4a   : > { %v793_v43 = vrot.slane %v2687_v31, 2  ;;  %v2704_v28 = vshll.u32 %v2687_v31, 16  ;;  %v2707_v45 = vshrl.u32 %v2687_v31, 16  ;;  %v1033_v38 = vrot.slane %v2687_v31, 3 }
  0x4b   : > { %585 = vrot.lane.b32.xlu0 %v550_v36, %s2341_s11 }
  0x4c   : > { %601 = vrot.lane.b32.xlu1 %v566_v37, %s2341_s11  ;;  %v2727_v63 = vsel %vm783_vm1, %v791_v23, %v793_v43  ;;  %v919_v1 = vrot.slane %v2707_v45, 2  ;;  %v920_v7 = vrot.slane %v2704_v28, 3 }
  0x4e   : > { %v2741_v23 = vor.u32 %v920_v7, %v919_v1  ;;  %v459_v1 = vor.u32 %v2609_v41, %v455_v24  ;;  %v463_v7 = vrot.slane %v2628_v51, 1  ;;  %v407_v24 = vrot.slane %v2704_v28, 1 }
  0x4f   : > { %629 = vrot.lane.b32.xlu0 %v550_v36, %s2340_s10  ;;  %v808_v36 = vsel %vm783_vm1, %v805_v22, %v807_v26  ;;  %v918_v22 = vsel %vm903_vm4, %v2529_v60, %v917_v6  ;;  %v3943_v60 = vrot.slane %v2548_v9, 3  ;;  %v471_v51 = vrot.slane %v2712_v56, 1 }
  0x50   : > { %645 = vrot.lane.b32.xlu1 %v566_v37, %s2340_s10  ;;  %v809_v37 = vrot.slane %v2684_v30, 2 }
  0x52   : > { %v2721_v61 = vsel %vm783_vm1, %v807_v26, %v809_v37 }
  0x53   : > { %631 = vrot.lane.b32.xlu0 %v2643_v55, %s2340_s10 }
  0x54   : > { %647 = vrot.lane.b32.xlu1 %v2638_v54, %s2340_s10 }
  0x57   : > { %751 = vrot.lane.b32.xlu0 %v676_v10, %s2345_s27 }
  0x58   : > { %767 = vrot.lane.b32.xlu1 %v708_v12, %s2345_s27  ;;  %v949_v12 = vor.u32 %v948_v53, %v947_v50  ;;  %v395_v50 = vor.u32 %v2488_v39, %v391_v21  ;;  %v399_v53 = vrot.slane %v2621_v46, 1  ;;  %v464_v39 = vsel %vm356_vm2, %v459_v1, %v463_v7 }
  0x59   : > { %v467_v46 = vor.u32 %v2631_v52, %v463_v7  ;;  %v553_v52 = vrot.slane %v2687_v31, 1 }
  0x5a   : > { %v400_v17 = vsel %vm356_vm2, %v395_v50, %v399_v53  ;;  %v403_v21 = vor.u32 %v2624_v47, %v399_v53 }
  0x5b   : > { %753 = vrot.lane.b32.xlu0 %v680_v19, %s2345_s27  ;;  %v951_v19 = vrot.slane %v2715_v59, 2  ;;  %v472_v47 = vsel %vm356_vm2, %v467_v46, %v471_v51 }
  0x5c   : > { %769 = vrot.lane.b32.xlu1 %v712_v49, %s2345_s27  ;;  %v952_v49 = vrot.slane %v2712_v56, 3 }
  0x5f   : > { %825 = vrot.lane.b32.xlu0 %v2509_v48, %s2342_s13  ;;  %v943_v48 = vrot.slane %v2609_v41, 2 }
  0x60   : > { %841 = vrot.lane.b32.xlu1 %v2678_v25, %s2342_s13 }
  0x61   : > { %v2731_v10 = vor.u32 %v944_v44, %v943_v48  ;;  %v1031_v48 = vrot.slane %v2600_v35, 3 }
  0x63   : > { %827 = vrot.lane.b32.xlu0 %v792_v33, %s2342_s13  ;;  %3973 = vst [vmem:[#allocation9_spill] sm:$0xff] %v2731_v10  ;;  %v950_v26 = vsel %vm903_vm4, %v2731_v10, %v949_v12  ;;  %v1032_v18 = vsel %vm1025_vm5, %v1029_v14, %v1031_v48  ;;  %v1049_v14 = vrot.slane %v2684_v30, 3  ;;  %v1034_v16 = vsel %vm1025_vm5, %v1031_v48, %v1033_v38 }
  0x64   : > { %843 = vrot.lane.b32.xlu1 %v808_v36, %s2342_s13 }
  0x65   : > { %v1050_v41 = vsel %vm1025_vm5, %v1047_v8, %v1049_v14 }
  0x67   : > { %871 = vrot.lane.b32.xlu0 %v792_v33, %s2343_s14  ;;  %v2745_v33 = vor.u32 %v952_v49, %v951_v19  ;;  %v569_v19 = vrot.slane %v2684_v30, 1  ;;  %v2805_v49 = vld [vmem:[%s2416_s4 + $0x78] sm:$0xff]  }
  0x68   : > { %887 = vrot.lane.b32.xlu1 %v808_v36, %s2343_s14  ;;  %v922_v36 = vsel %vm903_vm4, %v917_v6, %v2741_v23  ;;  %v1048_v6 = vsel %vm1025_vm5, %v3943_v60, %v1047_v8  ;;  %v3947_v48 = vrot.slane %v2805_v49, 1  ;;  %v2833_v8 = vshll.u32 %v2805_v49, 16 }
  0x69   : > { %v954_v44 = vsel %vm903_vm4, %v949_v12, %v2745_v33  ;;  %v408_v12 = vsel %vm356_vm2, %v403_v21, %v407_v24 }
  0x6a   : > { %v718_v21 = vrot.slane %v2833_v8, 2  ;;  %v479_v31 = vrot.slane %v2833_v8, 1 }
  0x6b   : > { %873 = vrot.lane.b32.xlu0 %v2727_v63, %s2343_s14 }
  0x6c   : > { %889 = vrot.lane.b32.xlu1 %v2721_v61, %s2343_s14 }
  0x6f   : > { %993 = vrot.lane.b32.xlu0 %v918_v22, %s2346_s28  ;;  %v2808_v22 = vld [vmem:[%s2416_s4 + $0x38] sm:$0xff]  }
  0x70   : > { %1009 = vrot.lane.b32.xlu1 %v950_v26, %s2346_s28  ;;  %v554_v26 = vsel %vm541_vm0, %v551_v27, %v553_v52  ;;  %v2825_v35 = vshll.u32 %v2808_v22, 16  ;;  %v2828_v27 = vshrl.u32 %v2808_v22, 16 }
  0x72   : > { %v686_v1 = vrot.slane %v2825_v35, 2 }
  0x73   : > { %995 = vrot.lane.b32.xlu0 %v922_v36, %s2346_s28  ;;  %v570_v36 = vsel %vm541_vm0, %v567_v42, %v569_v19  ;;  %v714_v42 = vrot.slane %v2712_v56, 2 }
  0x74   : > { %1011 = vrot.lane.b32.xlu1 %v954_v44, %s2346_s28  ;;  %v681_v44 = vrot.slane %v2707_v45, 1 }
  0x77   : > { %1067 = vrot.lane.b32.xlu0 %v1032_v18, %s2347_s29  ;;  %v2836_v18 = vshrl.u32 %v2805_v49, 16 }
  0x78   : > { %1083 = vrot.lane.b32.xlu1 %v1048_v6, %s2347_s29  ;;  %v685_v6 = vrot.slane %v2828_v27, 1 }
  0x7b   : > { %513 = vrot.lane.b32.xlu0 %v400_v17, %s2344_s23  ;;  %v2850_v17 = vsel %vm541_vm0, %v569_v19, %v3947_v48 }
  0x7c   : > { %529 = vrot.lane.b32.xlu1 %v464_v39, %s2344_s23  ;;  %v715_v39 = vor.u32 %v714_v42, %v713_v34  ;;  %v811_v42 = vrot.slane %v2805_v49, 2 }
  0x7f   : > { %1069 = vrot.lane.b32.xlu0 %v1034_v16, %s2347_s29  ;;  %v717_v16 = vrot.slane %v2836_v18, 1 }
  0x80   : > { %1085 = vrot.lane.b32.xlu1 %v1050_v41, %s2347_s29 }
  0x81   : > { %v2864_v19 = vor.u32 %v718_v21, %v717_v16 }
  0x83   : > { %515 = vrot.lane.b32.xlu0 %v408_v12, %s2344_s23  ;;  %v2860_v12 = vor.u32 %v686_v1, %v685_v6  ;;  %v2881_v1 = vld [vmem:[%s2416_s4 + $0x80] sm:$0xff]  }
  0x84   : > { %531 = vrot.lane.b32.xlu1 %v472_v47, %s2344_s23  ;;  %v2917_v60 = vshrl.u32 %v2881_v1, 16  ;;  %v3950_v56 = vrot.slane %v2881_v1, 3  ;;  %v3980_v9 = vrot.slane %v2881_v1, 2 }
  0x87   : > { %587 = vrot.lane.b32.xlu0 %v2643_v55, %s2341_s11  ;;  %v555_v55 = vrot.slane %v2808_v22, 1 }
  0x88   : > { %603 = vrot.lane.b32.xlu1 %v2638_v54, %s2341_s11  ;;  %v682_v54 = vrot.slane %v2704_v28, 2 }
  0x89   : > { %v2843_v50 = vsel %vm541_vm0, %v553_v52, %v555_v55  ;;  %v716_v52 = vsel %vm661_vm3, %v2662_v13, %v715_v39  ;;  %v795_v13 = vrot.slane %v2808_v22, 2 }
  0x8a   : > { %v683_v53 = vor.u32 %v682_v54, %v681_v44 }
  0x8b   : > { %589 = vrot.lane.b32.xlu0 %v554_v26, %s2341_s11  ;;  %v796_v16 = vsel %vm783_vm1, %v793_v43, %v795_v13  ;;  %v3948_v43 = vrot.slane %v2881_v1, 2 }
  0x8c   : > { %605 = vrot.lane.b32.xlu1 %v570_v36, %s2341_s11  ;;  %v684_v46 = vsel %vm661_vm3, %v2658_v11, %v683_v53  ;;  %v720_v11 = vsel %vm661_vm3, %v715_v39, %v2864_v19  ;;  %v2884_v39 = vld [vmem:[%s2416_s4 + $0x40] sm:$0xff]  }
  0x8f   : > { %633 = vrot.lane.b32.xlu0 %v554_v26, %s2340_s10 }
  0x90   : > { %649 = vrot.lane.b32.xlu1 %v570_v36, %s2340_s10  ;;  %v688_v36 = vsel %vm661_vm3, %v683_v53, %v2860_v12 }
  0x91   : > { %v626_v7 = vpop.permute.xlu0 %625 }
  0x92   : > { %v580_v41 = vpop.permute.xlu1 %579 }
  0x93   : > { %635 = vrot.lane.b32.xlu0 %v2843_v50, %s2340_s10 }
  0x94   : > { %651 = vrot.lane.b32.xlu1 %v2850_v17, %s2340_s10 }
  0x95   : > { %v822_v47 = vpop.permute.xlu0 %821 }
  0x96   : > { %v582_v26 = vpop.permute.xlu1 %581 }
  0x97   : > { %755 = vrot.lane.b32.xlu0 %v684_v46, %s2345_s27  ;;  %v812_v46 = vsel %vm783_vm1, %v809_v37, %v811_v42  ;;  %v923_v37 = vrot.slane %v2828_v27, 2 }
  0x98   : > { %771 = vrot.lane.b32.xlu1 %v716_v52, %s2345_s27 }
  0x99   : > { %v868_v44 = vpop.permute.xlu0 %867 }
  0x9a   : > { %v628_v54 = vpop.permute.xlu1 %627 }
  0x9b   : > { %757 = vrot.lane.b32.xlu0 %v688_v36, %s2345_s27  ;;  %v3954_v36 = vrot.slane %v2884_v39, 2 }
  0x9c   : > { %773 = vrot.lane.b32.xlu1 %v720_v11, %s2345_s27  ;;  %v955_v11 = vrot.slane %v2836_v18, 2 }
  0x9d   : > { %v506_v34 = vpop.permute.xlu0 %505 }
  0x9e   : > { %v824_v6 = vpop.permute.xlu1 %823  ;;  %v1101_v53 = vsel %vm1099_vm7, %v2430_v2, %v506_v34  ;;  %v2909_v34 = vshrl.u32 %v2884_v39, 16 }
  0x9f   : > { %829 = vrot.lane.b32.xlu0 %v2727_v63, %s2342_s13  ;;  %v1138_v2 = vsel %vm1136_vm8, %v1101_v53, %v580_v41  ;;  %v924_v41 = vrot.slane %v2825_v35, 3 }
  0xa0   : > { %845 = vrot.lane.b32.xlu1 %v2721_v61, %s2342_s13 }
  0xa1   : > { %v508_v21 = vpop.permute.xlu0 %507 }
  0xa2   : > { %v870_v63 = vpop.permute.xlu1 %869  ;;  %v1103_v52 = vsel %vm1099_vm7, %v2419_v0, %v508_v21  ;;  %v2906_v0 = vshll.u32 %v2884_v39, 16  ;;  %v956_v21 = vrot.slane %v2833_v8, 3 }
  0xa3   : > { %v1140_v61 = vsel %vm1136_vm8, %v1103_v52, %v582_v26  ;;  %831 = vrot.lane.b32.xlu0 %v796_v16, %s2342_s13  ;;  %v1175_v26 = vsel %vm1173_vm9, %v1138_v2, %v626_v7  ;;  %v2914_v52 = vshll.u32 %v2881_v1, 16  ;;  %v2926_v7 = vsel %vm783_vm1, %v811_v42, %v3948_v43 }
  0xa4   : > { %847 = vrot.lane.b32.xlu1 %v812_v46, %s2342_s13  ;;  %v1177_v29 = vsel %vm1173_vm9, %v1140_v61, %v628_v54  ;;  %v2932_v2 = vsel %vm783_vm1, %v795_v13, %v3954_v36  ;;  %v925_v54 = vor.u32 %v924_v41, %v923_v37  ;;  %v927_v61 = vrot.slane %v2909_v34, 2 }
  0xa5   : > { %v748_v53 = vpop.permute.xlu0 %747  ;;  %v960_v42 = vrot.slane %v2914_v52, 3 }
  0xa6   : > { %v750_v20 = vpop.permute.xlu1 %749  ;;  %v1212_v3 = vsel %vm1210_vm10, %v1175_v26, %v748_v53  ;;  %v957_v26 = vor.u32 %v956_v21, %v955_v11  ;;  %v959_v53 = vrot.slane %v2917_v60, 2 }
  0xa7   : > { %v1249_v48 = vsel %vm1247_vm11, %v1212_v3, %v822_v47  ;;  %875 = vrot.lane.b32.xlu0 %v796_v16, %s2343_s14  ;;  %v928_v3 = vrot.slane %v2906_v0, 3  ;;  %v1214_v47 = vsel %vm1210_vm10, %v1177_v29, %v750_v20  ;;  %v926_v29 = vsel %vm903_vm4, %v2741_v23, %v925_v54 }
  0xa8   : > { %891 = vrot.lane.b32.xlu1 %v812_v46, %s2343_s14  ;;  %v1286_v43 = vsel %vm1284_vm12, %v1249_v48, %v868_v44  ;;  %v1251_v13 = vsel %vm1247_vm11, %v1214_v47, %v824_v6  ;;  %v958_v48 = vsel %vm903_vm4, %v2745_v33, %v957_v26  ;;  %v2952_v44 = vor.u32 %v960_v42, %v959_v53 }
  0xa9   : > { %v990_v16 = vpop.permute.xlu0 %989  ;;  %v2947_v20 = vor.u32 %v928_v3, %v927_v61  ;;  %v1288_v21 = vsel %vm1284_vm12, %v1251_v13, %v870_v63  ;;  %v1051_v3 = vrot.slane %v2805_v49, 3  ;;  %v415_v53 = vrot.slane %v2825_v35, 1 }
  0xaa   : > { %v992_v46 = vpop.permute.xlu1 %991  ;;  %v1323_v11 = vsel %vm1321_vm13, %v1286_v43, %v990_v16  ;;  %v1035_v43 = vrot.slane %v2808_v22, 3  ;;  %v962_v61 = vsel %vm903_vm4, %v957_v26, %v2952_v44  ;;  %v411_v26 = vor.u32 %v2707_v45, %v407_v24 }
  0xab   : > { %877 = vrot.lane.b32.xlu0 %v2932_v2, %s2343_s14  ;;  %v930_v23 = vsel %vm903_vm4, %v925_v54, %v2947_v20  ;;  %v1325_v63 = vsel %vm1321_vm13, %v1288_v21, %v992_v46  ;;  %v1052_v46 = vsel %vm1025_vm5, %v1049_v14, %v1051_v3  ;;  %v475_v13 = vor.u32 %v2715_v59, %v471_v51 }
  0xac   : > { %893 = vrot.lane.b32.xlu1 %v2926_v7, %s2343_s14  ;;  %v1036_v54 = vsel %vm1025_vm5, %v1033_v38, %v1035_v43  ;;  %v416_v28 = vsel %vm356_vm2, %v411_v26, %v415_v53  ;;  %v3952_v45 = vrot.slane %v2884_v39, 3  ;;  %v419_v24 = vor.u32 %v2828_v27, %v415_v53 }
  0xad   : > { %v1064_v37 = vpop.permute.xlu0 %1063  ;;  %v480_v30 = vsel %vm356_vm2, %v475_v13, %v479_v31  ;;  %v3951_v51 = vrot.slane %v2906_v0, 1  ;;  %v1054_v8 = vsel %vm1025_vm5, %v1051_v3, %v3950_v56  ;;  %v3974_v26 = vrot.slane %v2805_v49, 1 }
  0xae   : > { %v2954_v41 = vpop.permute.xlu1 %509  ;;  %v1360_v6 = vsel %vm1358_vm14, %v1323_v11, %v1064_v37  ;;  %v1038_v59 = vsel %vm1025_vm5, %v1035_v43, %v3952_v45  ;;  %v483_v11 = vor.u32 %v2836_v18, %v479_v31  ;;  %v3949_v37 = vrot.slane %v2914_v52, 1 }
  0xaf   : > { %997 = vrot.lane.b32.xlu0 %v926_v29, %s2346_s28  ;;  %2132 = vmatprep.mubr.msk.bf16.mxu0 %vm1418_vm15, %v1360_v6  ;;  %v424_v27 = vsel %vm356_vm2, %v419_v24, %v3951_v51  ;;  %v689_v22 = vrot.slane %v2909_v34, 1 }
  0xb0   : > { %1013 = vrot.lane.b32.xlu1 %v958_v48, %s2346_s28  ;;  %v488_v18 = vsel %vm356_vm2, %v483_v11, %v3949_v37 }
  0xb1   : > { %v2964_v33 = vpop.permute.xlu0 %525 }
  0xb2   : > { %v1066_v47 = vpop.permute.xlu1 %1065 }
  0xb3   : > { %v1362_v16 = vsel %vm1358_vm14, %v1325_v63, %v1066_v47  ;;  %999 = vrot.lane.b32.xlu0 %v930_v23, %s2346_s28  ;;  %v557_v23 = vrot.slane %v2884_v39, 1  ;;  %v3041_v63 = vld [vmem:[%s2416_s4 + $0x88] sm:$0xff]  }
  0xb4   : > { %1015 = vrot.lane.b32.xlu1 %v962_v61, %s2346_s28  ;;  %2133 = vmatmul.mubr.msk.bf16.vlgmr.msra.gmra.mrb[0].mxu0 %vm1418_vm15, %v1362_v16  ;;  %v573_v61 = vrot.slane %v2881_v1, 1  ;;  %v3044_v47 = vld [vmem:[%s2416_s4 + $0x48] sm:$0xff]   ;;  %v3080_v24 = vshrl.u32 %v3041_v63, 16 }
  0xb5   : > { %v2981_v42 = vpop.permute.xlu0 %511  ;;  %v558_v16 = vsel %vm541_vm0, %v555_v55, %v557_v23  ;;  %v3953_v13 = vrot.slane %v3044_v47, 1  ;;  %v690_v55 = vrot.slane %v2906_v0, 2  ;;  %v3070_v49 = vshrl.u32 %v3044_v47, 16 }
  0xb6   : > { %v2990_v29 = vpop.permute.xlu1 %527  ;;  %v574_v53 = vsel %vm541_vm0, %v3974_v26, %v573_v61 }
  0xb7   : > { %1071 = vrot.lane.b32.xlu0 %v1036_v54, %s2347_s29  ;;  %v3089_v11 = vsel %vm541_vm0, %v557_v23, %v3953_v13  ;;  %v931_v62 = vrot.slane %v3070_v49, 2 }
  0xb8   : > { %1087 = vrot.lane.b32.xlu1 %v1052_v46, %s2347_s29 }
  0xb9   : > { %v2996_v38 = vpop.permute.xlu0 %583 }
  0xba   : > { %v3000_v14 = vpop.permute.xlu1 %599 }
  0xbb   : > { %517 = vrot.lane.b32.xlu0 %v416_v28, %s2344_s23  ;;  %v721_v28 = vrot.slane %v2917_v60, 1 }
  0xbc   : > { %533 = vrot.lane.b32.xlu1 %v480_v30, %s2344_s23  ;;  %v722_v30 = vrot.slane %v2914_v52, 2 }
  0xbd   : > { %v3009_v35 = vpop.permute.xlu0 %585 }
  0xbe   : > { %v3016_v48 = vpop.permute.xlu1 %601  ;;  %v723_v51 = vor.u32 %v722_v30, %v721_v28 }
  0xbf   : > { %1073 = vrot.lane.b32.xlu0 %v1038_v59, %s2347_s29  ;;  %v3077_v59 = vshll.u32 %v3041_v63, 16 }
  0xc0   : > { %1089 = vrot.lane.b32.xlu1 %v1054_v8, %s2347_s29 }
  0xc1   : > { %v3023_v6 = vpop.permute.xlu0 %629 }
  0xc2   : > { %v3028_v21 = vpop.permute.xlu1 %645 }
  0xc3   : > { %519 = vrot.lane.b32.xlu0 %v424_v27, %s2344_s23  ;;  %v691_v27 = vor.u32 %v690_v55, %v689_v22  ;;  %v724_v55 = vsel %vm661_vm3, %v2864_v19, %v723_v51  ;;  %v259_v19 = vld [vmem:[%s2416_s4 + $0x94] sm:$0xf] }
  0xc4   : > { %535 = vrot.lane.b32.xlu1 %v488_v18, %s2344_s23  ;;  %v693_v18 = vrot.slane %v3070_v49, 1 }
  0xc5   : > { %v3033_v43 = vpop.permute.xlu0 %631  ;;  %v692_v23 = vsel %vm661_vm3, %v2860_v12, %v691_v27 }
  0xc6   : > { %v3036_v3 = vpop.permute.xlu1 %647 }
  0xc7   : > { %591 = vrot.lane.b32.xlu0 %v2843_v50, %s2341_s11  ;;  %v3060_v50 = vrot.slane %v3041_v63, 1 }
  0xc8   : > { %607 = vrot.lane.b32.xlu1 %v2850_v17, %s2341_s11  ;;  %v3067_v17 = vshll.u32 %v3044_v47, 16 }
  0xc9   : > { %v3051_v54 = vpop.permute.xlu0 %751  ;;  %3975 = vst [vmem:[#allocation10_spill] sm:$0xff] %v3060_v50  ;;  %v3095_v56 = vsel %vm541_vm0, %v573_v61, %v3060_v50 }
  0xca   : > { %v3056_v46 = vpop.permute.xlu1 %767  ;;  %v694_v26 = vrot.slane %v3067_v17, 2  ;;  %3976 = vst [vmem:[#allocation11_spill] sm:$0xff] %v3095_v56 }
  0xcb   : > { %593 = vrot.lane.b32.xlu0 %v558_v16, %s2341_s11 }
  0xcc   : > { %609 = vrot.lane.b32.xlu1 %v574_v53, %s2341_s11  ;;  %v3105_v22 = vor.u32 %v694_v26, %v693_v18  ;;  %v3123_v26 = vld [vmem:[%s2416_s4 + $0x90] sm:$0xf] }
  0xcd   : > { %v3072_v31 = vpop.permute.xlu0 %753 }
  0xce   : > { %v3082_v8 = vpop.permute.xlu1 %769  ;;  %3977 = vst [vmem:[#allocation12_spill] sm:$0xff] %v3105_v22  ;;  %v696_v13 = vsel %vm661_vm3, %v691_v27, %v3105_v22 }
  0xcf   : > { %637 = vrot.lane.b32.xlu0 %v558_v16, %s2340_s10  ;;  %v725_v16 = vrot.slane %v3080_v24, 1 }
  0xd0   : > { %653 = vrot.lane.b32.xlu1 %v574_v53, %s2340_s10  ;;  %v726_v53 = vrot.slane %v3077_v59, 2 }
  0xd1   : > { %v826_v37 = vpop.permute.xlu0 %825 }
  0xd2   : > { %v842_v45 = vpop.permute.xlu1 %841  ;;  %v3111_v28 = vor.u32 %v726_v53, %v725_v16  ;;  %v799_v16 = vrot.slane %v3044_v47, 2 }
  0xd3   : > { %639 = vrot.lane.b32.xlu0 %v3089_v11, %s2340_s10 }
  0xd4   : > { %655 = vrot.lane.b32.xlu1 %v3095_v56, %s2340_s10  ;;  %3978 = vst [vmem:[#allocation13_spill] sm:$0xff] %v3111_v28  ;;  %v728_v12 = vsel %vm661_vm3, %v723_v51, %v3111_v28  ;;  %v3979_v51 = vrot.slane %v2884_v39, 2  ;;  %v1121_v28 = vsel %vm1099_vm7, %v2492_v40, %v2964_v33 }
  0xd5   : > { %v3107_v61 = vpop.permute.xlu0 %827 }
  0xd6   : > { %v3113_v30 = vpop.permute.xlu1 %843 }
  0xd7   : > { %759 = vrot.lane.b32.xlu0 %v692_v23, %s2345_s27  ;;  %v815_v23 = vrot.slane %v3041_v63, 2 }
  0xd8   : > { %775 = vrot.lane.b32.xlu1 %v724_v55, %s2345_s27  ;;  %v3134_v55 = vcombine.low %v3123_v26, %v259_v19 }
  0xd9   : > { %v872_v36 = vpop.permute.xlu0 %871  ;;  %v816_v10 = vsel %vm783_vm1, %v3980_v9, %v815_v23  ;;  %v932_v9 = vrot.slane %v3067_v17, 3 }
  0xda   : > { %v888_v18 = vpop.permute.xlu1 %887  ;;  %v3147_v5 = vrot.slane %v3134_v55, 2  ;;  %v730_v32 = vshrl.u32 %v3134_v55, 16  ;;  %v733_v50 = vshll.u32 %v3134_v55, 16 }
  0xdb   : > { %761 = vrot.lane.b32.xlu0 %v696_v13, %s2345_s27  ;;  %v800_v13 = vsel %vm783_vm1, %v3979_v51, %v799_v16  ;;  %v964_v51 = vrot.slane %v3077_v59, 3 }
  0xdc   : > { %777 = vrot.lane.b32.xlu1 %v728_v12, %s2345_s27 }
  0xdd   : > { %v3128_v53 = vpop.permute.xlu0 %873 }
  0xde   : > { %v3131_v27 = vpop.permute.xlu1 %889 }
  0xdf   : > { %833 = vrot.lane.b32.xlu0 %v2932_v2, %s2342_s13  ;;  %v963_v2 = vrot.slane %v3080_v24, 2 }
  0xe0   : > { %849 = vrot.lane.b32.xlu1 %v2926_v7, %s2342_s13  ;;  %v1105_v7 = vsel %vm1099_vm7, %v2270_v15, %v2954_v41  ;;  %v1158_v15 = vsel %vm1136_vm8, %v1121_v28, %v3000_v14  ;;  %v3981_v14 = vrot.slane %v2492_v40, 2 }
  0xe1   : > { %v994_v12 = vpop.permute.xlu0 %993  ;;  %v1142_v19 = vsel %vm1136_vm8, %v1105_v7, %v2996_v38  ;;  %v1195_v56 = vsel %vm1173_vm9, %v1158_v15, %v3028_v21  ;;  %v3176_v7 = vsel %vm783_vm1, %v815_v23, %v3147_v5  ;;  %v965_v21 = vor.u32 %v964_v51, %v963_v2 }
  0xe2   : > { %v1010_v25 = vpop.permute.xlu1 %1009  ;;  %v1179_v41 = vsel %vm1173_vm9, %v1142_v19, %v3023_v6  ;;  %v3181_v6 = vsel %vm783_vm1, %v799_v16, %v3981_v14  ;;  %v1232_v28 = vsel %vm1210_vm10, %v1195_v56, %v3056_v46  ;;  %v936_v16 = vrot.slane %v2525_v58, 3 }
  0xe3   : > { %835 = vrot.lane.b32.xlu0 %v800_v13, %s2342_s13  ;;  %v1216_v33 = vsel %vm1210_vm10, %v1179_v41, %v3051_v54  ;;  %v933_v54 = vor.u32 %v932_v9, %v931_v62  ;;  %v1269_v15 = vsel %vm1247_vm11, %v1232_v28, %v842_v45  ;;  %v935_v41 = vrot.slane %v2538_v4, 2 }
  0xe4   : > { %851 = vrot.lane.b32.xlu1 %v816_v10, %s2342_s13  ;;  %v1253_v19 = vsel %vm1247_vm11, %v1216_v33, %v826_v37  ;;  %v1306_v14 = vsel %vm1284_vm12, %v1269_v15, %v888_v18  ;;  %v967_v46 = vrot.slane %v730_v32, 2  ;;  %v968_v62 = vrot.slane %v733_v50, 3 }
  0xe5   : > { %v996_v22 = vpop.permute.xlu0 %995  ;;  %v1290_v23 = vsel %vm1284_vm12, %v1253_v19, %v872_v36  ;;  %v1343_v45 = vsel %vm1321_vm13, %v1306_v14, %v1010_v25  ;;  %v1123_v25 = vsel %vm1099_vm7, %v2522_v57, %v2990_v29  ;;  %v966_v29 = vsel %vm903_vm4, %v2952_v44, %v965_v21 }
  0xe6   : > { %v1012_v38 = vpop.permute.xlu1 %1011  ;;  %v1327_v56 = vsel %vm1321_vm13, %v1290_v23, %v994_v12  ;;  %v934_v12 = vsel %vm903_vm4, %v2947_v20, %v933_v54  ;;  %v1160_v9 = vsel %vm1136_vm8, %v1123_v25, %v3016_v48  ;;  %v3227_v28 = vor.u32 %v968_v62, %v967_v46 }
  0xe7   : > { %879 = vrot.lane.b32.xlu0 %v800_v13, %s2343_s14  ;;  %v2271_v13 = vld [vmem:[%s2416_s4 + $0x18] sm:$0xff]   ;;  %v3984_v62 = vrot.slane %v2881_v1, 3  ;;  %v3285_v1 = vld [vmem:[%s2416_s4 + $0x50] sm:$0xff]  }
  0xe8   : > { %895 = vrot.lane.b32.xlu1 %v816_v10, %s2343_s14  ;;  %v1107_v2 = vsel %vm1099_vm7, %v2271_v13, %v2981_v42  ;;  %v3217_v42 = vor.u32 %v936_v16, %v935_v41  ;;  %v970_v16 = vsel %vm903_vm4, %v965_v21, %v3227_v28  ;;  %v2071_v13 = vcombine.low %v3123_v26, %v3123_v26 }
  0xe9   : > { %v1068_v37 = vpop.permute.xlu0 %1067  ;;  %v1144_v51 = vsel %vm1136_vm8, %v1107_v2, %v3009_v35  ;;  %v1197_v35 = vsel %vm1173_vm9, %v1160_v9, %v3036_v3 }
  0xea   : > { %v1084_v36 = vpop.permute.xlu1 %1083  ;;  %v1364_v10 = vsel %vm1358_vm14, %v1327_v56, %v1068_v37  ;;  %v1181_v20 = vsel %vm1173_vm9, %v1144_v51, %v3033_v43  ;;  %v1234_v48 = vsel %vm1210_vm10, %v1197_v35, %v3082_v8  ;;  %v938_v3 = vsel %vm903_vm4, %v933_v54, %v3217_v42 }
  0xeb   : > { %881 = vrot.lane.b32.xlu0 %v3181_v6, %s2343_s14  ;;  %2136 = vmatprep.mubr.msk.bf16.mxu0 %vm1418_vm15, %v1364_v10  ;;  %v1380_v18 = vsel %vm1358_vm14, %v1343_v45, %v1084_v36  ;;  %v1218_v19 = vsel %vm1210_vm10, %v1181_v20, %v3072_v31  ;;  %v1271_v44 = vsel %vm1247_vm11, %v1234_v48, %v3113_v30  ;;  %v1039_v31 = vrot.slane %v3044_v47, 3 }
  0xec   : > { %897 = vrot.lane.b32.xlu1 %v3176_v7, %s2343_s14  ;;  %2152 = vmatprep.mubr.msk.bf16.mxu1 %vm1418_vm15, %v1380_v18  ;;  %v1255_v43 = vsel %vm1247_vm11, %v1218_v19, %v3107_v61  ;;  %v1308_v8 = vsel %vm1284_vm12, %v1271_v44, %v3131_v27  ;;  %v1055_v30 = vrot.slane %v3041_v63, 3  ;;  %v431_v37 = vrot.slane %v3067_v17, 1 }
  0xed   : > { %v3223_v33 = vpop.permute.xlu0 %513  ;;  %v1292_v23 = vsel %vm1284_vm12, %v1255_v43, %v3128_v53  ;;  %v1345_v53 = vsel %vm1321_vm13, %v1308_v8, %v1012_v38  ;;  %v3983_v38 = vrot.slane %v2906_v0, 1  ;;  %v3985_v36 = vrot.slane %v2914_v52, 1 }
  0xee   : > { %v3233_v15 = vpop.permute.xlu1 %529  ;;  %v1329_v61 = vsel %vm1321_vm13, %v1292_v23, %v996_v22  ;;  %v3982_v22 = vrot.slane %v2884_v39, 3  ;;  %v1056_v45 = vsel %vm1025_vm5, %v3984_v62, %v1055_v30  ;;  %v495_v39 = vrot.slane %v3077_v59, 1  ;;  %v260_v23 = vld [vmem:[%s2416_s4 + $0x98] sm:$0xf] }
  0xef   : > { %1001 = vrot.lane.b32.xlu0 %v934_v12, %s2346_s28  ;;  %v427_v21 = vor.u32 %v2909_v34, %v3983_v38  ;;  %v491_v10 = vor.u32 %v2917_v60, %v3985_v36  ;;  %v1041_v17 = vrot.slane %v3285_v1, 3  ;;  %v1057_v59 = vrot.slane %v3134_v55, 3 }
  0xf0   : > { %1017 = vrot.lane.b32.xlu1 %v966_v29, %s2346_s28  ;;  %v1040_v27 = vsel %vm1025_vm5, %v3982_v22, %v1039_v31  ;;  %v501_v2 = vshll.u32 %v2071_v13, 16  ;;  %v435_v12 = vor.u32 %v3070_v49, %v431_v37  ;;  %v499_v9 = vor.u32 %v3080_v24, %v495_v39 }
  0xf1   : > { %v1070_v41 = vpop.permute.xlu0 %1069  ;;  %v432_v34 = vsel %vm356_vm2, %v427_v21, %v431_v37  ;;  %v496_v60 = vsel %vm356_vm2, %v491_v10, %v495_v39  ;;  %v1042_v18 = vsel %vm1025_vm5, %v1039_v31, %v1041_v17  ;;  %v1058_v51 = vsel %vm1025_vm5, %v1055_v30, %v1057_v59  ;;  %v3987_v31 = vld [vmem:[#allocation11_spill] sm:$0xff] }
  0xf2   : > { %v1086_v14 = vpop.permute.xlu1 %1085  ;;  %v1366_v56 = vsel %vm1358_vm14, %v1329_v61, %v1070_v41  ;;  %v503_v20 = vrot.slane %v501_v2, 1  ;;  %v3986_v35 = vrot.slane %v2525_v58, 1  ;;  %v577_v44 = vrot.slane %v2071_v13, 1  ;;  %v3991_v2 = vld [vmem:[#allocation6_spill] sm:$0xff] }
  0xf3   : > { %v1382_v54 = vsel %vm1358_vm14, %v1345_v53, %v1086_v14  ;;  %1003 = vrot.lane.b32.xlu0 %v938_v3, %s2346_s28  ;;  %2137 = vmatmul.mubr.msk.bf16.gmra.mrb[4].mxu0 %vm1418_vm15, %v1366_v56  ;;  %v3988_v8 = vrot.slane %v2492_v40, 1  ;;  %v3989_v61 = vrot.slane %v3044_v47, 1  ;;  %v2073_v30 = vcombine.low %v260_v23, %v260_v23  ;;  %v3990_v14 = vld [vmem:[#allocation10_spill] sm:$0xff] }
  0xf4   : > { %1019 = vrot.lane.b32.xlu1 %v970_v16, %s2346_s28  ;;  %2153 = vmatmul.mubr.msk.bf16.vlgmr.msra.gmra.mrb[0].mxu1 %vm1418_vm15, %v1382_v54  ;;  %v440_v49 = vsel %vm356_vm2, %v435_v12, %v3986_v35  ;;  %v504_v48 = vsel %vm356_vm2, %v499_v9, %v503_v20  ;;  %v621_v16 = vrot.slane %v3134_v55, 1  ;;  %v578_v56 = vsel %vm541_vm0, %v3990_v14, %v577_v44 }
  0xf5   : > { %v3268_v46 = vpop.permute.xlu0 %515  ;;  %v562_v41 = vsel %vm541_vm0, %v3989_v61, %v3988_v8  ;;  %v623_v22 = vrot.slane %v2073_v30, 1  ;;  %v698_v38 = vrot.slane %v2525_v58, 2  ;;  %v732_v37 = vrot.slane %v730_v32, 1 }
  0xf6   : > { %v3279_v0 = vpop.permute.xlu1 %531  ;;  %v735_v62 = vrot.slane %v733_v50, 2  ;;  %v742_v36 = vshll.u32 %v2073_v30, 16  ;;  %v3992_v50 = vld [vmem:[#allocation12_spill] sm:$0xff] }
  0xf7   : > { %1075 = vrot.lane.b32.xlu0 %v1040_v27, %s2347_s29  ;;  %v697_v27 = vrot.slane %v2538_v4, 1  ;;  %v624_v58 = vsel %vm541_vm0, %v621_v16, %v623_v22  ;;  %v3387_v22 = vld [vmem:[%s2416_s4 + $0xa0] ss:$0 sps:$4 sm:$0x77]  }
  0xf8   : > { %1091 = vrot.lane.b32.xlu1 %v1056_v45, %s2347_s29  ;;  %v739_v45 = vshrl.u32 %v2073_v30, 16  ;;  %v736_v13 = vor.u32 %v735_v62, %v732_v37 }
  0xf9   : > { %v3288_v52 = vpop.permute.xlu0 %587  ;;  %v699_v4 = vor.u32 %v698_v38, %v697_v27  ;;  %v3995_v38 = vrot.slane %v2522_v57, 2  ;;  %v865_v57 = vrot.slane %v3387_v22, 2 }
  0xfa   : > { %v3292_v26 = vpop.permute.xlu1 %603 }
  0xfb   : > { %521 = vrot.lane.b32.xlu0 %v432_v34, %s2344_s23  ;;  %v741_v34 = vrot.slane %v739_v45, 1 }
  0xfc   : > { %537 = vrot.lane.b32.xlu1 %v496_v60, %s2344_s23  ;;  %v744_v60 = vrot.slane %v742_v36, 2 }
  0xfd   : > { %v3300_v25 = vpop.permute.xlu0 %589 }
  0xfe   : > { %v3306_v29 = vpop.permute.xlu1 %605  ;;  %v745_v20 = vor.u32 %v744_v60, %v741_v34 }
  0xff   : > { %1077 = vrot.lane.b32.xlu0 %v1042_v18, %s2347_s29  ;;  %v700_v18 = vsel %vm661_vm3, %v3992_v50, %v699_v4  ;;  %v3998_v50 = vld [vmem:[#allocation3_spill] sm:$0xff] }
 0x100   : > { %1093 = vrot.lane.b32.xlu1 %v1058_v51, %s2347_s29  ;;  %v3993_v51 = vld [vmem:[#allocation13_spill] sm:$0xff]  ;;  %v746_v8 = vsel %vm661_vm3, %v736_v13, %v745_v20  ;;  %v981_v20 = vshrl.u32 %v3387_v22, 16 }
 0x101   : > { %v3313_v19 = vpop.permute.xlu0 %633  ;;  %v737_v9 = vsel %vm661_vm3, %v3993_v51, %v736_v13  ;;  %v2274_v13 = vld [vmem:[%s2416_s4 + $0x60] sm:$0xff]  }
 0x102   : > { %v3316_v43 = vpop.permute.xlu1 %649  ;;  %v1125_v34 = vsel %vm1099_vm7, %v2274_v13, %v3233_v15  ;;  %v984_v15 = vshll.u32 %v3387_v22, 16 }
 0x103   : > { %523 = vrot.lane.b32.xlu0 %v440_v49, %s2344_s23  ;;  %v261_v49 = vld [vmem:[%s2416_s4 + $0x9c] sm:$0xf] }
 0x104   : > { %539 = vrot.lane.b32.xlu1 %v504_v48, %s2344_s23  ;;  %v3994_v48 = vld [vmem:[#allocation7_spill] sm:$0xff] }
 0x105   : > { %v3320_v24 = vpop.permute.xlu0 %635  ;;  %v704_v44 = vsel %vm661_vm3, %v699_v4, %v3994_v48  ;;  %v2273_v4 = vld [vmem:[%s2416_s4 + $0x20] sm:$0xff]  }
 0x106   : > { %v3323_v3 = vpop.permute.xlu1 %651 }
 0x107   : > { %595 = vrot.lane.b32.xlu0 %v3089_v11, %s2341_s11  ;;  %v622_v11 = vsel %vm541_vm0, %v3990_v14, %v621_v16  ;;  %v819_v14 = vrot.slane %v2073_v30, 2  ;;  %v3996_v30 = vrot.slane %v2492_v40, 2 }
 0x108   : > { %611 = vrot.lane.b32.xlu1 %v3987_v31, %s2341_s11 }
 0x109   : > { %v3335_v53 = vpop.permute.xlu0 %755  ;;  %v804_v37 = vsel %vm783_vm1, %v3996_v30, %v3995_v38  ;;  %v986_v38 = vrot.slane %v984_v15, 3  ;;  %v4001_v15 = vld [vmem:[#allocation4_spill] sm:$0xff] }
 0x10a   : > { %v3339_v54 = vpop.permute.xlu1 %771 }
 0x10b   : > { %597 = vrot.lane.b32.xlu0 %v562_v41, %s2341_s11 }
 0x10c   : > { %613 = vrot.lane.b32.xlu1 %v578_v56, %s2341_s11 }
 0x10d   : > { %v3347_v21 = vpop.permute.xlu0 %757 }
 0x10e   : > { %v3353_v10 = vpop.permute.xlu1 %773 }
 0x10f   : > { %641 = vrot.lane.b32.xlu0 %v562_v41, %s2340_s10  ;;  %v3375_v41 = vcombine.low %v260_v23, %v261_v49 }
 0x110   : > { %657 = vrot.lane.b32.xlu1 %v622_v11, %s2340_s10 }
 0x111   : > { %v830_v39 = vpop.permute.xlu0 %829  ;;  %v863_v11 = vrot.slane %v3375_v41, 2  ;;  %v972_v23 = vshrl.u32 %v3375_v41, 16  ;;  %v975_v27 = vshll.u32 %v3375_v41, 16 }
 0x112   : > { %v846_v32 = vpop.permute.xlu1 %845 }
 0x113   : > { %643 = vrot.lane.b32.xlu0 %v3991_v2, %s2340_s10  ;;  %v864_v36 = vsel %vm783_vm1, %v3147_v5, %v863_v11  ;;  %v977_v40 = vrot.slane %v975_v27, 3 }
 0x114   : > { %659 = vrot.lane.b32.xlu1 %v624_v58, %s2340_s10  ;;  %v1109_v58 = vsel %vm1099_vm7, %v2273_v4, %v3223_v33  ;;  %v1162_v33 = vsel %vm1136_vm8, %v1125_v34, %v3292_v26  ;;  %v2277_v34 = vld [vmem:[%s2416_s4 + $0x58] sm:$0xff]  }
 0x115   : > { %v3363_v12 = vpop.permute.xlu0 %831  ;;  %v1146_v60 = vsel %vm1136_vm8, %v1109_v58, %v3288_v52  ;;  %v1199_v52 = vsel %vm1173_vm9, %v1162_v33, %v3316_v43 }
 0x116   : > { %v3367_v35 = vpop.permute.xlu1 %847  ;;  %v1183_v51 = vsel %vm1173_vm9, %v1146_v60, %v3313_v19  ;;  %v866_v19 = vsel %vm783_vm1, %v863_v11, %v865_v57  ;;  %v1043_v60 = vrot.slane %v2277_v34, 3 }
 0x117   : > { %763 = vrot.lane.b32.xlu0 %v700_v18, %s2345_s27  ;;  %v940_v18 = vrot.slane %v3998_v50, 3  ;;  %v1220_v49 = vsel %vm1210_vm10, %v1183_v51, %v3335_v53 }
 0x118   : > { %779 = vrot.lane.b32.xlu1 %v737_v9, %s2345_s27  ;;  %v1257_v26 = vsel %vm1247_vm11, %v1220_v49, %v830_v39  ;;  %v983_v39 = vrot.slane %v981_v20, 2 }
 0x119   : > { %v876_v31 = vpop.permute.xlu0 %875 }
 0x11a   : > { %v892_v61 = vpop.permute.xlu1 %891 }
 0x11b   : > { %765 = vrot.lane.b32.xlu0 %v704_v44, %s2345_s27  ;;  %v1236_v44 = vsel %vm1210_vm10, %v1199_v52, %v3339_v54  ;;  %v4002_v52 = vrot.slane %v4001_v15, 3 }
 0x11c   : > { %781 = vrot.lane.b32.xlu1 %v746_v8, %s2345_s27  ;;  %v1273_v8 = vsel %vm1247_vm11, %v1236_v44, %v846_v32  ;;  %v2275_v32 = vld [vmem:[%s2416_s4 + $0x28] sm:$0xff]  }
 0x11d   : > { %v3379_v16 = vpop.permute.xlu0 %877  ;;  %v1046_v49 = vsel %vm1025_vm5, %v1043_v60, %v4002_v52 }
 0x11e   : > { %v3381_v56 = vpop.permute.xlu1 %893 }
 0x11f   : > { %837 = vrot.lane.b32.xlu0 %v3181_v6, %s2342_s13  ;;  %v820_v6 = vsel %vm783_vm1, %v3147_v5, %v819_v14  ;;  %v3997_v5 = vld [vmem:[#allocation5_spill] sm:$0xff]  ;;  %v1294_v14 = vsel %vm1284_vm12, %v1257_v26, %v876_v31  ;;  %v1111_v31 = vsel %vm1099_vm7, %v2275_v32, %v3268_v46 }
 0x120   : > { %853 = vrot.lane.b32.xlu1 %v3176_v7, %s2342_s13  ;;  %v974_v7 = vrot.slane %v972_v23, 2  ;;  %v939_v2 = vrot.slane %v3997_v5, 2  ;;  %v1310_v23 = vsel %vm1284_vm12, %v1273_v8, %v892_v61  ;;  %v2276_v61 = vld [vmem:[%s2416_s4 + $0x68] sm:$0xff]  }
 0x121   : > { %v998_v62 = vpop.permute.xlu0 %997 }
 0x122   : > { %v1014_v45 = vpop.permute.xlu1 %1013  ;;  %v978_v43 = vor.u32 %v977_v40, %v974_v7  ;;  %v941_v53 = vor.u32 %v940_v18, %v939_v2  ;;  %v1331_v54 = vsel %vm1321_vm13, %v1294_v14, %v998_v62  ;;  %v1127_v62 = vsel %vm1099_vm7, %v2276_v61, %v3279_v0  ;;  %v2279_v61 = vld [vmem:[%s2416_s4 + $0x70] sm:$0xff]  }
 0x123   : > { %839 = vrot.lane.b32.xlu0 %v804_v37, %s2342_s13  ;;  %v1347_v30 = vsel %vm1321_vm13, %v1310_v23, %v1014_v45  ;;  %v1148_v45 = vsel %vm1136_vm8, %v1111_v31, %v3300_v25  ;;  %v1164_v4 = vsel %vm1136_vm8, %v1127_v62, %v3306_v29  ;;  %v987_v25 = vor.u32 %v986_v38, %v983_v39 }
 0x124   : > { %855 = vrot.lane.b32.xlu1 %v820_v6, %s2342_s13  ;;  %v942_v46 = vsel %vm903_vm4, %v3217_v42, %v941_v53  ;;  %v1185_v58 = vsel %vm1173_vm9, %v1148_v45, %v3320_v24  ;;  %v979_v0 = vsel %vm903_vm4, %v3227_v28, %v978_v43  ;;  %v1201_v7 = vsel %vm1173_vm9, %v1164_v4, %v3323_v3  ;;  %v4000_v3 = vld [vmem:[#allocation9_spill] sm:$0xff] }
 0x125   : > { %v1000_v9 = vpop.permute.xlu0 %999  ;;  %v1222_v40 = vsel %vm1210_vm10, %v1185_v58, %v3347_v21  ;;  %v1238_v13 = vsel %vm1210_vm10, %v1201_v7, %v3353_v10  ;;  %v946_v21 = vsel %vm903_vm4, %v941_v53, %v4000_v3  ;;  %v988_v2 = vsel %vm903_vm4, %v978_v43, %v987_v25 }
 0x126   : > { %v1016_v48 = vpop.permute.xlu1 %1015  ;;  %v1259_v29 = vsel %vm1247_vm11, %v1222_v40, %v3363_v12  ;;  %v1275_v24 = vsel %vm1247_vm11, %v1238_v13, %v3367_v35  ;;  %v1059_v35 = vrot.slane %v3375_v41, 3 }
 0x127   : > { %883 = vrot.lane.b32.xlu0 %v804_v37, %s2343_s14  ;;  %v1296_v28 = vsel %vm1284_vm12, %v1259_v29, %v3379_v16  ;;  %v1312_v10 = vsel %vm1284_vm12, %v1275_v24, %v3381_v56  ;;  %v1044_v56 = vsel %vm1025_vm5, %v1041_v17, %v1043_v60  ;;  %v2280_v60 = vld [vmem:[%s2416_s4 + $0x38] sm:$0xff]  }
 0x128   : > { %899 = vrot.lane.b32.xlu1 %v864_v36, %s2343_s14  ;;  %v3999_v36 = vld [vmem:[#allocation8_spill] sm:$0xff]  ;;  %v1333_v12 = vsel %vm1321_vm13, %v1296_v28, %v1000_v9  ;;  %v1349_v50 = vsel %vm1321_vm13, %v1312_v10, %v1016_v48  ;;  %v1060_v51 = vsel %vm1025_vm5, %v1057_v59, %v1059_v35  ;;  %v1061_v9 = vrot.slane %v3387_v22, 3 }
 0x129   : > { %v1072_v27 = vpop.permute.xlu0 %1071 }
 0x12a   : > { %v1088_v37 = vpop.permute.xlu1 %1087  ;;  %v1368_v11 = vsel %vm1358_vm14, %v1331_v54, %v1072_v27  ;;  %v1062_v1 = vsel %vm1025_vm5, %v1059_v35, %v1061_v9 }
 0x12b   : > { %v1384_v6 = vsel %vm1358_vm14, %v1347_v30, %v1088_v37  ;;  %885 = vrot.lane.b32.xlu0 %v3999_v36, %s2343_s14  ;;  %2140 = vmatprep.mubr.msk.bf16.mxu0 %vm1418_vm15, %v1368_v11 }
 0x12c   : > { %901 = vrot.lane.b32.xlu1 %v866_v19, %s2343_s14  ;;  %2156 = vmatprep.mubr.msk.bf16.mxu1 %vm1418_vm15, %v1384_v6  ;;  %v2278_v6 = vld [vmem:[%s2416_s4 + $0x30] sm:$0xff]  }
 0x12d   : > { %v3457_v57 = vpop.permute.xlu0 %517 }
 0x12e   : > { %v534_v42 = vpop.permute.xlu1 %533  ;;  %v1113_v36 = vsel %vm1099_vm7, %v2278_v6, %v3457_v57 }
 0x12f   : > { %1005 = vrot.lane.b32.xlu0 %v942_v46, %s2346_s28  ;;  %v1129_v62 = vsel %vm1099_vm7, %v2279_v61, %v534_v42 }
 0x130   : > { %1021 = vrot.lane.b32.xlu1 %v979_v0, %s2346_s28 }
 0x131   : > { %v1074_v5 = vpop.permute.xlu0 %1073 }
 0x132   : > { %v1090_v16 = vpop.permute.xlu1 %1089  ;;  %v1370_v18 = vsel %vm1358_vm14, %v1333_v12, %v1074_v5  ;;  %v2281_v5 = vld [vmem:[%s2416_s4 + $0x78] sm:$0xff]  }
 0x133   : > { %v1386_v33 = vsel %vm1358_vm14, %v1349_v50, %v1090_v16  ;;  %1007 = vrot.lane.b32.xlu0 %v946_v21, %s2346_s28  ;;  %2141 = vmatmul.mubr.msk.bf16.gmra.mrb[8].mxu0 %vm1418_vm15, %v1370_v18 }
 0x134   : > { %1023 = vrot.lane.b32.xlu1 %v988_v2, %s2346_s28  ;;  %2157 = vmatmul.mubr.msk.bf16.gmra.mrb[4].mxu1 %vm1418_vm15, %v1386_v33 }
 0x135   : > { %v520_v41 = vpop.permute.xlu0 %519 }
 0x136   : > { %v536_v20 = vpop.permute.xlu1 %535  ;;  %v1115_v10 = vsel %vm1099_vm7, %v2280_v60, %v520_v41 }
 0x137   : > { %1079 = vrot.lane.b32.xlu0 %v1044_v56, %s2347_s29  ;;  %v1131_v2 = vsel %vm1099_vm7, %v2281_v5, %v536_v20 }
 0x138   : > { %1095 = vrot.lane.b32.xlu1 %v1060_v51, %s2347_s29 }
 0x139   : > { %v592_v48 = vpop.permute.xlu0 %591 }
 0x13a   : > { %v608_v17 = vpop.permute.xlu1 %607  ;;  %v1150_v45 = vsel %vm1136_vm8, %v1113_v36, %v592_v48 }
 0x13b   : > { %1081 = vrot.lane.b32.xlu0 %v1046_v49, %s2347_s29  ;;  %v1166_v46 = vsel %vm1136_vm8, %v1129_v62, %v608_v17 }
 0x13c   : > { %1097 = vrot.lane.b32.xlu1 %v1062_v1, %s2347_s29 }
 0x13d   : > { %v594_v55 = vpop.permute.xlu0 %593 }
 0x13e   : > { %v610_v59 = vpop.permute.xlu1 %609  ;;  %v1152_v35 = vsel %vm1136_vm8, %v1115_v10, %v594_v55 }
 0x13f   : > { %v1168_v50 = vsel %vm1136_vm8, %v1131_v2, %v610_v59 }
 0x141   : > { %v638_v22 = vpop.permute.xlu0 %637 }
 0x142   : > { %v654_v44 = vpop.permute.xlu1 %653  ;;  %v1187_v4 = vsel %vm1173_vm9, %v1150_v45, %v638_v22 }
 0x143   : > { %v1203_v0 = vsel %vm1173_vm9, %v1166_v46, %v654_v44 }
 0x145   : > { %v640_v26 = vpop.permute.xlu0 %639 }
 0x146   : > { %v656_v19 = vpop.permute.xlu1 %655  ;;  %v1189_v16 = vsel %vm1173_vm9, %v1152_v35, %v640_v26 }
 0x147   : > { %v1205_v33 = vsel %vm1173_vm9, %v1168_v50, %v656_v19 }
 0x149   : > { %v760_v8 = vpop.permute.xlu0 %759 }
 0x14a   : > { %v776_v14 = vpop.permute.xlu1 %775  ;;  %v1224_v25 = vsel %vm1210_vm10, %v1187_v4, %v760_v8 }
 0x14b   : > { %v1240_v40 = vsel %vm1210_vm10, %v1203_v0, %v776_v14 }
 0x14d   : > { %v762_v43 = vpop.permute.xlu0 %761 }
 0x14e   : > { %v778_v53 = vpop.permute.xlu1 %777  ;;  %v1226_v56 = vsel %vm1210_vm10, %v1189_v16, %v762_v43 }
 0x14f   : > { %v1242_v51 = vsel %vm1210_vm10, %v1205_v33, %v778_v53 }
 0x151   : > { %v834_v23 = vpop.permute.xlu0 %833 }
 0x152   : > { %v850_v54 = vpop.permute.xlu1 %849  ;;  %v1261_v57 = vsel %vm1247_vm11, %v1224_v25, %v834_v23 }
 0x153   : > { %v1277_v42 = vsel %vm1247_vm11, %v1240_v40, %v850_v54 }
 0x155   : > { %v836_v27 = vpop.permute.xlu0 %835 }
 0x156   : > { %v852_v39 = vpop.permute.xlu1 %851  ;;  %v1263_v9 = vsel %vm1247_vm11, %v1226_v56, %v836_v27 }
 0x157   : > { %v1279_v20 = vsel %vm1247_vm11, %v1242_v51, %v852_v39 }
 0x159   : > { %v880_v38 = vpop.permute.xlu0 %879 }
 0x15a   : > { %v896_v30 = vpop.permute.xlu1 %895  ;;  %v1298_v13 = vsel %vm1284_vm12, %v1261_v57, %v880_v38  ;;  %v2283_v57 = vld [vmem:[%s2416_s4 + $0x80] sm:$0xff]  }
 0x15b   : > { %v1314_v29 = vsel %vm1284_vm12, %v1277_v42, %v896_v30 }
 0x15d   : > { %v882_v37 = vpop.permute.xlu0 %881 }
 0x15e   : > { %v898_v11 = vpop.permute.xlu1 %897  ;;  %v1300_v15 = vsel %vm1284_vm12, %v1263_v9, %v882_v37 }
 0x15f   : > { %v1316_v52 = vsel %vm1284_vm12, %v1279_v20, %v898_v11 }
 0x161   : > { %v1002_v32 = vpop.permute.xlu0 %1001 }
 0x162   : > { %v1018_v31 = vpop.permute.xlu1 %1017  ;;  %v1335_v24 = vsel %vm1321_vm13, %v1298_v13, %v1002_v32 }
 0x163   : > { %v1351_v3 = vsel %vm1321_vm13, %v1314_v29, %v1018_v31 }
 0x165   : > { %v1004_v58 = vpop.permute.xlu0 %1003 }
 0x166   : > { %v1020_v7 = vpop.permute.xlu1 %1019  ;;  %v1337_v49 = vsel %vm1321_vm13, %v1300_v15, %v1004_v58 }
 0x167   : > { %v1353_v1 = vsel %vm1321_vm13, %v1316_v52, %v1020_v7  ;;  %v2282_v7 = vld [vmem:[%s2416_s4 + $0x40] sm:$0xff]  }
 0x169   : > { %v1076_v28 = vpop.permute.xlu0 %1075 }
 0x16a   : > { %v1092_v21 = vpop.permute.xlu1 %1091  ;;  %v1372_v34 = vsel %vm1358_vm14, %v1335_v24, %v1076_v28 }
 0x16b   : > { %v1388_v12 = vsel %vm1358_vm14, %v1351_v3, %v1092_v21  ;;  %2144 = vmatprep.mubr.msk.bf16.mxu0 %vm1418_vm15, %v1372_v34 }
 0x16c   : > { %2160 = vmatprep.mubr.msk.bf16.mxu1 %vm1418_vm15, %v1388_v12 }
 0x16d   : > { %v522_v18 = vpop.permute.xlu0 %521 }
 0x16e   : > { %v538_v41 = vpop.permute.xlu1 %537  ;;  %v1117_v40 = vsel %vm1099_vm7, %v2282_v7, %v522_v18 }
 0x16f   : > { %v1133_v42 = vsel %vm1099_vm7, %v2283_v57, %v538_v41 }
 0x171   : > { %v1078_v48 = vpop.permute.xlu0 %1077 }
 0x172   : > { %v1094_v17 = vpop.permute.xlu1 %1093  ;;  %v1374_v55 = vsel %vm1358_vm14, %v1337_v49, %v1078_v48 }
 0x173   : > { %v1390_v59 = vsel %vm1358_vm14, %v1353_v1, %v1094_v17  ;;  %2145 = vmatmul.mubr.msk.bf16.gmra.mrb[12].mxu0 %vm1418_vm15, %v1374_v55 }
 0x174   : > { %2161 = vmatmul.mubr.msk.bf16.gmra.mrb[8].mxu1 %vm1418_vm15, %v1390_v59 }
 0x175   : > { %v524_v22 = vpop.permute.xlu0 %523 }
 0x176   : > { %v540_v44 = vpop.permute.xlu1 %539  ;;  %v1119_v60 = vsel %vm1099_vm7, %v3044_v47, %v524_v22 }
 0x177   : > { %v1135_v5 = vsel %vm1099_vm7, %v3041_v63, %v540_v44 }
 0x179   : > { %v596_v26 = vpop.permute.xlu0 %595 }
 0x17a   : > { %v612_v19 = vpop.permute.xlu1 %611  ;;  %v1154_v13 = vsel %vm1136_vm8, %v1117_v40, %v596_v26 }
 0x17b   : > { %v1170_v29 = vsel %vm1136_vm8, %v1133_v42, %v612_v19 }
 0x17d   : > { %v598_v8 = vpop.permute.xlu0 %597 }
 0x17e   : > { %v614_v14 = vpop.permute.xlu1 %613  ;;  %v1156_v2 = vsel %vm1136_vm8, %v1119_v60, %v598_v8 }
 0x17f   : > { %v1172_v16 = vsel %vm1136_vm8, %v1135_v5, %v614_v14 }
 0x181   : > { %v642_v43 = vpop.permute.xlu0 %641 }
 0x182   : > { %v658_v53 = vpop.permute.xlu1 %657  ;;  %v1191_v24 = vsel %vm1173_vm9, %v1154_v13, %v642_v43 }
 0x183   : > { %v1207_v3 = vsel %vm1173_vm9, %v1170_v29, %v658_v53 }
 0x185   : > { %v644_v23 = vpop.permute.xlu0 %643 }
 0x186   : > { %v660_v54 = vpop.permute.xlu1 %659  ;;  %v1193_v18 = vsel %vm1173_vm9, %v1156_v2, %v644_v23 }
 0x187   : > { %v3546_v27 = vpop.f32.mrb[0].mxu0  ;;  %v1209_v41 = vsel %vm1173_vm9, %v1172_v16, %v660_v54 }
 0x188   : > { %v3548_v39 = vpop.f32.mrb[1].mxu0  ;;  %1642 = vst.msk [vmem:[#allocation2 + $0x10] sm:$0xff] (!%p2098_p9), %vm1210_vm10, %v3546_v27 }
 0x189   : > { %v3550_v38 = vpop.f32.mrb[2].mxu0  ;;  %v764_v30 = vpop.permute.xlu0 %763  ;;  %1640 = vst.msk [vmem:[#allocation2] sm:$0xff] (!%p2098_p9), %vm1210_vm10, %v3548_v39 }
 0x18a   : > { %v780_v37 = vpop.permute.xlu1 %779  ;;  %v3552_v11 = vpop.f32.mrb[3].mxu0  ;;  %v1228_v21 = vsel %vm1210_vm10, %v1191_v24, %v764_v30  ;;  %1643 = vst.msk [vmem:[#allocation2 + $0x18] sm:$0xff] (!%p2098_p9), %vm1210_vm10, %v3550_v38 }
 0x18b   : > { %v1244_v10 = vsel %vm1210_vm10, %v1207_v3, %v780_v37  ;;  %1641 = vst.msk [vmem:[#allocation2 + $0x8] sm:$0xff] (!%p2098_p9), %vm1210_vm10, %v3552_v11 }
 0x18d   : > { %v766_v32 = vpop.permute.xlu0 %765 }
 0x18e   : > { %v782_v31 = vpop.permute.xlu1 %781  ;;  %v1230_v51 = vsel %vm1210_vm10, %v1193_v18, %v766_v32 }
 0x18f   : > { %v1246_v15 = vsel %vm1210_vm10, %v1209_v41, %v782_v31 }
 0x191   : > { %v838_v6 = vpop.permute.xlu0 %837 }
 0x192   : > { %v854_v36 = vpop.permute.xlu1 %853  ;;  %v1265_v12 = vsel %vm1247_vm11, %v1228_v21, %v838_v6 }
 0x193   : > { %v1281_v35 = vsel %vm1247_vm11, %v1244_v10, %v854_v36 }
 0x195   : > { %v840_v61 = vpop.permute.xlu0 %839 }
 0x196   : > { %v856_v62 = vpop.permute.xlu1 %855  ;;  %v1267_v52 = vsel %vm1247_vm11, %v1230_v51, %v840_v61 }
 0x197   : > { %v1283_v48 = vsel %vm1247_vm11, %v1246_v15, %v856_v62 }
 0x199   : > { %v884_v45 = vpop.permute.xlu0 %883 }
 0x19a   : > { %v900_v46 = vpop.permute.xlu1 %899  ;;  %v1302_v50 = vsel %vm1284_vm12, %v1265_v12, %v884_v45 }
 0x19b   : > { %v1318_v33 = vsel %vm1284_vm12, %v1281_v35, %v900_v46 }
 0x19d   : > { %v886_v4 = vpop.permute.xlu0 %885 }
 0x19e   : > { %v902_v58 = vpop.permute.xlu1 %901  ;;  %v1304_v1 = vsel %vm1284_vm12, %v1267_v52, %v886_v4 }
 0x19f   : > { %v1320_v17 = vsel %vm1284_vm12, %v1283_v48, %v902_v58 }
 0x1a1   : > { %v1006_v0 = vpop.permute.xlu0 %1005 }
 0x1a2   : > { %v1022_v25 = vpop.permute.xlu1 %1021  ;;  %v1339_v47 = vsel %vm1321_vm13, %v1302_v50, %v1006_v0 }
 0x1a3   : > { %v1355_v63 = vsel %vm1321_vm13, %v1318_v33, %v1022_v25 }
 0x1a5   : > { %v1008_v28 = vpop.permute.xlu0 %1007 }
 0x1a6   : > { %v1024_v34 = vpop.permute.xlu1 %1023  ;;  %v1341_v55 = vsel %vm1321_vm13, %v1304_v1, %v1008_v28 }
 0x1a7   : > { %v1357_v22 = vsel %vm1321_vm13, %v1320_v17, %v1024_v34 }
 0x1a9   : > { %v1080_v56 = vpop.permute.xlu0 %1079 }
 0x1aa   : > { %v1096_v9 = vpop.permute.xlu1 %1095  ;;  %v1376_v20 = vsel %vm1358_vm14, %v1339_v47, %v1080_v56 }
 0x1ab   : > { %v1392_v49 = vsel %vm1358_vm14, %v1355_v63, %v1096_v9  ;;  %2148 = vmatprep.mubr.msk.bf16.mxu0 %vm1418_vm15, %v1376_v20 }
 0x1ac   : > { %2164 = vmatprep.mubr.msk.bf16.mxu1 %vm1418_vm15, %v1392_v49 }
 0x1ad   : > { %v1082_v59 = vpop.permute.xlu0 %1081 }
 0x1ae   : > { %v1098_v44 = vpop.permute.xlu1 %1097  ;;  %v1378_v26 = vsel %vm1358_vm14, %v1341_v55, %v1082_v59 }
 0x1af   : > { %v1394_v19 = vsel %vm1358_vm14, %v1357_v22, %v1098_v44  ;;  %2149 = vmatmul.mubr.msk.bf16.gmra.mrb[16].mxu0 %vm1418_vm15, %v1378_v26 }
 0x1b0   : > { %2165 = vmatmul.mubr.msk.bf16.gmra.mrb[12].mxu1 %vm1418_vm15, %v1394_v19 }
 0x1c6   : > { %v3594_v8 = vpop.f32.mrb[4].mxu0 }
 0x1c7   : > { %v3596_v14 = vpop.f32.mrb[0].mxu1  ;;  %v3598_v43 = vpop.f32.mrb[5].mxu0  ;;  %1646 = vst.msk [vmem:[#allocation2 + $0x30] sm:$0xff] (!%p2098_p9), %vm1210_vm10, %v3594_v8 }
 0x1c8   : > { %v3600_v53 = vpop.f32.mrb[1].mxu1  ;;  %v3602_v23 = vpop.f32.mrb[6].mxu0  ;;  %1644 = vst.msk [vmem:[#allocation2 + $0x20] sm:$0xff] (!%p2098_p9), %vm1210_vm10, %v3598_v43  ;;  %1662 = vst.msk [vmem:[#allocation2 + $0xb0] sm:$0xff] (!%p2098_p9), %vm1210_vm10, %v3596_v14 }
 0x1c9   : > { %v3604_v54 = vpop.f32.mrb[2].mxu1  ;;  %v3606_v30 = vpop.f32.mrb[7].mxu0  ;;  %1647 = vst.msk [vmem:[#allocation2 + $0x38] sm:$0xff] (!%p2098_p9), %vm1210_vm10, %v3602_v23  ;;  %1660 = vst.msk [vmem:[#allocation2 + $0xa0] sm:$0xff] (!%p2098_p9), %vm1210_vm10, %v3600_v53 }
 0x1ca   : > { %v3608_v37 = vpop.f32.mrb[3].mxu1  ;;  %1645 = vst.msk [vmem:[#allocation2 + $0x28] sm:$0xff] (!%p2098_p9), %vm1210_vm10, %v3606_v30  ;;  %1663 = vst.msk [vmem:[#allocation2 + $0xb8] sm:$0xff] (!%p2098_p9), %vm1210_vm10, %v3604_v54 }
 0x1cb   : > { %1661 = vst.msk [vmem:[#allocation2 + $0xa8] sm:$0xff] (!%p2098_p9), %vm1210_vm10, %v3608_v37 }
 0x206   : > { %v3610_v32 = vpop.f32.mrb[8].mxu0 }
 0x207   : > { %v3612_v31 = vpop.f32.mrb[4].mxu1  ;;  %v3614_v6 = vpop.f32.mrb[9].mxu0  ;;  %1650 = vst.msk [vmem:[#allocation2 + $0x50] sm:$0xff] (!%p2098_p9), %vm1210_vm10, %v3610_v32 }
 0x208   : > { %v3616_v36 = vpop.f32.mrb[5].mxu1  ;;  %v3618_v61 = vpop.f32.mrb[10].mxu0  ;;  %1648 = vst.msk [vmem:[#allocation2 + $0x40] sm:$0xff] (!%p2098_p9), %vm1210_vm10, %v3614_v6  ;;  %1666 = vst.msk [vmem:[#allocation2 + $0xd0] sm:$0xff] (!%p2098_p9), %vm1210_vm10, %v3612_v31 }
 0x209   : > { %v3620_v62 = vpop.f32.mrb[6].mxu1  ;;  %v3622_v45 = vpop.f32.mrb[11].mxu0  ;;  %1651 = vst.msk [vmem:[#allocation2 + $0x58] sm:$0xff] (!%p2098_p9), %vm1210_vm10, %v3618_v61  ;;  %1664 = vst.msk [vmem:[#allocation2 + $0xc0] sm:$0xff] (!%p2098_p9), %vm1210_vm10, %v3616_v36 }
 0x20a   : > { %v3624_v46 = vpop.f32.mrb[7].mxu1  ;;  %1649 = vst.msk [vmem:[#allocation2 + $0x48] sm:$0xff] (!%p2098_p9), %vm1210_vm10, %v3622_v45  ;;  %1667 = vst.msk [vmem:[#allocation2 + $0xd8] sm:$0xff] (!%p2098_p9), %vm1210_vm10, %v3620_v62 }
 0x20b   : > { %1665 = vst.msk [vmem:[#allocation2 + $0xc8] sm:$0xff] (!%p2098_p9), %vm1210_vm10, %v3624_v46 }
 0x246   : > { %v3626_v4 = vpop.f32.mrb[12].mxu0 }
 0x247   : > { %v3628_v58 = vpop.f32.mrb[8].mxu1  ;;  %v3630_v0 = vpop.f32.mrb[13].mxu0  ;;  %1654 = vst.msk [vmem:[#allocation2 + $0x70] sm:$0xff] (!%p2098_p9), %vm1210_vm10, %v3626_v4 }
 0x248   : > { %v3632_v25 = vpop.f32.mrb[9].mxu1  ;;  %v3634_v7 = vpop.f32.mrb[14].mxu0  ;;  %1652 = vst.msk [vmem:[#allocation2 + $0x60] sm:$0xff] (!%p2098_p9), %vm1210_vm10, %v3630_v0  ;;  %1670 = vst.msk [vmem:[#allocation2 + $0xf0] sm:$0xff] (!%p2098_p9), %vm1210_vm10, %v3628_v58 }
 0x249   : > { %v3636_v40 = vpop.f32.mrb[10].mxu1  ;;  %v3638_v57 = vpop.f32.mrb[15].mxu0  ;;  %1655 = vst.msk [vmem:[#allocation2 + $0x78] sm:$0xff] (!%p2098_p9), %vm1210_vm10, %v3634_v7  ;;  %1668 = vst.msk [vmem:[#allocation2 + $0xe0] sm:$0xff] (!%p2098_p9), %vm1210_vm10, %v3632_v25 }
 0x24a   : > { %v3640_v42 = vpop.f32.mrb[11].mxu1  ;;  %1653 = vst.msk [vmem:[#allocation2 + $0x68] sm:$0xff] (!%p2098_p9), %vm1210_vm10, %v3638_v57  ;;  %1671 = vst.msk [vmem:[#allocation2 + $0xf8] sm:$0xff] (!%p2098_p9), %vm1210_vm10, %v3636_v40 }
 0x24b   : > { %1669 = vst.msk [vmem:[#allocation2 + $0xe8] sm:$0xff] (!%p2098_p9), %vm1210_vm10, %v3640_v42 }
 0x280   : > { %1639 = sbr.rel (%p2098_p9) target bundleno = 648 (0x288), region = 36 }
 0x282   : > { %v3642_v13 = vpop.f32.mrb[16].mxu0 }
 0x283   : > { %v3644_v29 = vpop.f32.mrb[12].mxu1  ;;  %v3646_v24 = vpop.f32.mrb[17].mxu0  ;;  %1658 = vst.msk [vmem:[#allocation2 + $0x90] sm:$0xff] (!%p2098_p9), %vm1210_vm10, %v3642_v13 }
 0x284   : > { %v3648_v28 = vpop.f32.mrb[13].mxu1  ;;  %v3650_v3 = vpop.f32.mrb[18].mxu0  ;;  %1656 = vst.msk [vmem:[#allocation2 + $0x80] sm:$0xff] (!%p2098_p9), %vm1210_vm10, %v3646_v24  ;;  %1674 = vst.msk [vmem:[#allocation2 + $0x110] sm:$0xff] (!%p2098_p9), %vm1210_vm10, %v3644_v29 }
 0x285   : > { %v3652_v21 = vpop.f32.mrb[14].mxu1  ;;  %v3654_v34 = vpop.f32.mrb[19].mxu0  ;;  %1659 = vst.msk [vmem:[#allocation2 + $0x98] sm:$0xff] (!%p2098_p9), %vm1210_vm10, %v3650_v3  ;;  %1672 = vst.msk [vmem:[#allocation2 + $0x100] sm:$0xff] (!%p2098_p9), %vm1210_vm10, %v3648_v28 }
 0x286   : > { %v3656_v60 = vpop.f32.mrb[15].mxu1  ;;  %1657 = vst.msk [vmem:[#allocation2 + $0x88] sm:$0xff] (!%p2098_p9), %vm1210_vm10, %v3654_v34  ;;  %1675 = vst.msk [vmem:[#allocation2 + $0x118] sm:$0xff] (!%p2098_p9), %vm1210_vm10, %v3652_v21 }
 0x287   : > { %1673 = vst.msk [vmem:[#allocation2 + $0x108] sm:$0xff] %vm1210_vm10, %v3656_v60 }
 0x288 PF: > { %p2099_p10 = scmp.eq.s32.totalorder %s2314_s12, 0 }
 0x289   : > { %v1680_v10 = vld [vmem:[#allocation2] sm:$0xff] (!%p2099_p10)  ;;  %v1681_v12 = vld [vmem:[#allocation2 + $0x8] sm:$0xff] (!%p2099_p10)  ;;  %v1682_v5 = vld [vmem:[#allocation2 + $0x10] sm:$0xff] (!%p2099_p10) }
 0x28a   : > { %1679 = sbr.rel (%p2099_p10) target bundleno = 670 (0x29e), region = 40  ;;  %v1716_v2 = vadd.f32 (!%p2099_p10), %v1680_v10, %v3548_v39  ;;  %v1717_v35 = vadd.f32 (!%p2099_p10), %v1681_v12, %v3552_v11  ;;  %v1718_v50 = vadd.f32 (!%p2099_p10), %v3546_v27, %v1682_v5  ;;  %v1683_v16 = vld [vmem:[#allocation2 + $0x18] sm:$0xff] (!%p2099_p10)  ;;  %v1684_v18 = vld [vmem:[#allocation2 + $0x20] sm:$0xff] (!%p2099_p10)  ;;  %v1685_v33 = vld [vmem:[#allocation2 + $0x28] sm:$0xff] (!%p2099_p10) }
 0x28b   : > { %v1719_v47 = vadd.f32 (!%p2099_p10), %v3550_v38, %v1683_v16  ;;  %v1720_v56 = vadd.f32 (!%p2099_p10), %v1684_v18, %v3598_v43  ;;  %v1721_v41 = vadd.f32 (!%p2099_p10), %v1685_v33, %v3606_v30  ;;  %v1686_v51 = vld [vmem:[#allocation2 + $0x30] sm:$0xff] (!%p2099_p10)  ;;  %v1687_v63 = vld [vmem:[#allocation2 + $0x38] sm:$0xff] (!%p2099_p10)  ;;  %v1688_v9 = vld [vmem:[#allocation2 + $0x40] sm:$0xff] (!%p2099_p10) }
 0x28c   : > { %1752 = vst.msk [vmem:[#allocation2] sm:$0xff] (!%p2099_p10), %vm1210_vm10, %v1716_v2  ;;  %1753 = vst.msk [vmem:[#allocation2 + $0x8] sm:$0xff] (!%p2099_p10), %vm1210_vm10, %v1717_v35  ;;  %v1722_v27 = vadd.f32 (!%p2099_p10), %v3594_v8, %v1686_v51  ;;  %v1723_v39 = vadd.f32 (!%p2099_p10), %v3602_v23, %v1687_v63  ;;  %v1724_v11 = vadd.f32 (!%p2099_p10), %v1688_v9, %v3614_v6  ;;  %v1689_v38 = vld [vmem:[#allocation2 + $0x48] sm:$0xff] (!%p2099_p10)  ;;  %v1690_v20 = vld [vmem:[#allocation2 + $0x50] sm:$0xff] (!%p2099_p10) }
 0x28d   : > { %1754 = vst.msk [vmem:[#allocation2 + $0x10] sm:$0xff] (!%p2099_p10), %vm1210_vm10, %v1718_v50  ;;  %v1691_v15 = vld [vmem:[#allocation2 + $0x58] sm:$0xff] (!%p2099_p10)  ;;  %1755 = vst.msk [vmem:[#allocation2 + $0x18] sm:$0xff] (!%p2099_p10), %vm1210_vm10, %v1719_v47  ;;  %v1725_v52 = vadd.f32 (!%p2099_p10), %v1689_v38, %v3622_v45  ;;  %v1726_v49 = vadd.f32 (!%p2099_p10), %v3610_v32, %v1690_v20  ;;  %v1692_v1 = vld [vmem:[#allocation2 + $0x60] sm:$0xff] (!%p2099_p10) }
 0x28e   : > { %1756 = vst.msk [vmem:[#allocation2 + $0x20] sm:$0xff] (!%p2099_p10), %vm1210_vm10, %v1720_v56  ;;  %1757 = vst.msk [vmem:[#allocation2 + $0x28] sm:$0xff] (!%p2099_p10), %vm1210_vm10, %v1721_v41  ;;  %v1727_v48 = vadd.f32 (!%p2099_p10), %v3618_v61, %v1691_v15  ;;  %v1693_v17 = vld [vmem:[#allocation2 + $0x68] sm:$0xff] (!%p2099_p10)  ;;  %v1694_v55 = vld [vmem:[#allocation2 + $0x70] sm:$0xff] (!%p2099_p10)  ;;  %v1728_v59 = vadd.f32 (!%p2099_p10), %v1692_v1, %v3630_v0 }
 0x28f   : > { %1758 = vst.msk [vmem:[#allocation2 + $0x30] sm:$0xff] (!%p2099_p10), %vm1210_vm10, %v1722_v27  ;;  %1759 = vst.msk [vmem:[#allocation2 + $0x38] sm:$0xff] (!%p2099_p10), %vm1210_vm10, %v1723_v39  ;;  %v1729_v22 = vadd.f32 (!%p2099_p10), %v1693_v17, %v3638_v57  ;;  %v1730_v44 = vadd.f32 (!%p2099_p10), %v3626_v4, %v1694_v55  ;;  %v1695_v26 = vld [vmem:[#allocation2 + $0x78] sm:$0xff] (!%p2099_p10)  ;;  %v1696_v19 = vld [vmem:[#allocation2 + $0x80] sm:$0xff] (!%p2099_p10) }
 0x290   : > { %1760 = vst.msk [vmem:[#allocation2 + $0x40] sm:$0xff] (!%p2099_p10), %vm1210_vm10, %v1724_v11  ;;  %v1697_v8 = vld [vmem:[#allocation2 + $0x88] sm:$0xff] (!%p2099_p10)  ;;  %1761 = vst.msk [vmem:[#allocation2 + $0x48] sm:$0xff] (!%p2099_p10), %vm1210_vm10, %v1725_v52  ;;  %v1731_v43 = vadd.f32 (!%p2099_p10), %v3634_v7, %v1695_v26  ;;  %v1732_v23 = vadd.f32 (!%p2099_p10), %v1696_v19, %v3646_v24  ;;  %v1698_v32 = vld [vmem:[#allocation2 + $0x90] sm:$0xff] (!%p2099_p10) }
 0x291   : > { %1762 = vst.msk [vmem:[#allocation2 + $0x50] sm:$0xff] %vm1210_vm10, %v1726_v49  ;;  %1763 = vst.msk [vmem:[#allocation2 + $0x58] sm:$0xff] %vm1210_vm10, %v1727_v48  ;;  %v1733_v30 = vadd.f32 %v1697_v8, %v3654_v34  ;;  %v1699_v6 = vld [vmem:[#allocation2 + $0x98] sm:$0xff]  ;;  %v1700_v61 = vld [vmem:[#allocation2 + $0xa0] sm:$0xff]  ;;  %v1734_v45 = vadd.f32 %v3642_v13, %v1698_v32 }
 0x292   : > { %1764 = vst.msk [vmem:[#allocation2 + $0x60] sm:$0xff] %vm1210_vm10, %v1728_v59  ;;  %1765 = vst.msk [vmem:[#allocation2 + $0x68] sm:$0xff] %vm1210_vm10, %v1729_v22  ;;  %v1735_v4 = vadd.f32 %v3650_v3, %v1699_v6  ;;  %v1736_v0 = vadd.f32 %v1700_v61, %v3600_v53  ;;  %v1701_v7 = vld [vmem:[#allocation2 + $0xa8] sm:$0xff]  ;;  %v1702_v57 = vld [vmem:[#allocation2 + $0xb0] sm:$0xff] }
 0x293   : > { %1766 = vst.msk [vmem:[#allocation2 + $0x70] sm:$0xff] %vm1210_vm10, %v1730_v44  ;;  %v1703_v24 = vld [vmem:[#allocation2 + $0xb8] sm:$0xff]  ;;  %1767 = vst.msk [vmem:[#allocation2 + $0x78] sm:$0xff] %vm1210_vm10, %v1731_v43  ;;  %v1737_v34 = vadd.f32 %v1701_v7, %v3608_v37  ;;  %v1738_v10 = vadd.f32 %v3596_v14, %v1702_v57  ;;  %v1704_v13 = vld [vmem:[#allocation2 + $0xc0] sm:$0xff] }
 0x294   : > { %1768 = vst.msk [vmem:[#allocation2 + $0x80] sm:$0xff] %vm1210_vm10, %v1732_v23  ;;  %1769 = vst.msk [vmem:[#allocation2 + $0x88] sm:$0xff] %vm1210_vm10, %v1733_v30  ;;  %v1739_v12 = vadd.f32 %v3604_v54, %v1703_v24  ;;  %v1705_v5 = vld [vmem:[#allocation2 + $0xc8] sm:$0xff]  ;;  %v1706_v3 = vld [vmem:[#allocation2 + $0xd0] sm:$0xff]  ;;  %v1740_v53 = vadd.f32 %v1704_v13, %v3616_v36 }
 0x295   : > { %1770 = vst.msk [vmem:[#allocation2 + $0x90] sm:$0xff] %vm1210_vm10, %v1734_v45  ;;  %1771 = vst.msk [vmem:[#allocation2 + $0x98] sm:$0xff] %vm1210_vm10, %v1735_v4  ;;  %v1741_v2 = vadd.f32 %v1705_v5, %v3624_v46  ;;  %v1742_v35 = vadd.f32 %v3612_v31, %v1706_v3  ;;  %v1707_v37 = vld [vmem:[#allocation2 + $0xd8] sm:$0xff]  ;;  %v1708_v50 = vld [vmem:[#allocation2 + $0xe0] sm:$0xff] }
 0x296   : > { %1772 = vst.msk [vmem:[#allocation2 + $0xa0] sm:$0xff] %vm1210_vm10, %v1736_v0  ;;  %v1709_v14 = vld [vmem:[#allocation2 + $0xe8] sm:$0xff]  ;;  %1773 = vst.msk [vmem:[#allocation2 + $0xa8] sm:$0xff] %vm1210_vm10, %v1737_v34  ;;  %v1743_v54 = vadd.f32 %v3620_v62, %v1707_v37  ;;  %v1744_v16 = vadd.f32 %v1708_v50, %v3632_v25  ;;  %v1710_v36 = vld [vmem:[#allocation2 + $0xf0] sm:$0xff] }
 0x297   : > { %1774 = vst.msk [vmem:[#allocation2 + $0xb0] sm:$0xff] %vm1210_vm10, %v1738_v10  ;;  %1775 = vst.msk [vmem:[#allocation2 + $0xb8] sm:$0xff] %vm1210_vm10, %v1739_v12  ;;  %v1745_v18 = vadd.f32 %v1709_v14, %v3640_v42  ;;  %v1711_v33 = vld [vmem:[#allocation2 + $0xf8] sm:$0xff]  ;;  %v1712_v46 = vld [vmem:[#allocation2 + $0x100] sm:$0xff]  ;;  %v1746_v31 = vadd.f32 %v3628_v58, %v1710_v36 }
 0x298   : > { %1776 = vst.msk [vmem:[#allocation2 + $0xc0] sm:$0xff] %vm1210_vm10, %v1740_v53  ;;  %1777 = vst.msk [vmem:[#allocation2 + $0xc8] sm:$0xff] %vm1210_vm10, %v1741_v2  ;;  %v1747_v47 = vadd.f32 %v3636_v40, %v1711_v33  ;;  %v1748_v56 = vadd.f32 %v1712_v46, %v3648_v28  ;;  %v1713_v62 = vld [vmem:[#allocation2 + $0x108] sm:$0xff]  ;;  %v1714_v41 = vld [vmem:[#allocation2 + $0x110] sm:$0xff] }
 0x299   : > { %1778 = vst.msk [vmem:[#allocation2 + $0xd0] sm:$0xff] %vm1210_vm10, %v1742_v35  ;;  %v1715_v25 = vld [vmem:[#allocation2 + $0x118] sm:$0xff]  ;;  %1779 = vst.msk [vmem:[#allocation2 + $0xd8] sm:$0xff] %vm1210_vm10, %v1743_v54  ;;  %v1749_v42 = vadd.f32 %v1713_v62, %v3656_v60  ;;  %v1750_v51 = vadd.f32 %v3644_v29, %v1714_v41 }
 0x29a   : > { %1780 = vst.msk [vmem:[#allocation2 + $0xe0] sm:$0xff] %vm1210_vm10, %v1744_v16  ;;  %1781 = vst.msk [vmem:[#allocation2 + $0xe8] sm:$0xff] %vm1210_vm10, %v1745_v18  ;;  %v1751_v63 = vadd.f32 %v3652_v21, %v1715_v25 }
 0x29b   : > { %1782 = vst.msk [vmem:[#allocation2 + $0xf0] sm:$0xff] %vm1210_vm10, %v1746_v31  ;;  %1783 = vst.msk [vmem:[#allocation2 + $0xf8] sm:$0xff] %vm1210_vm10, %v1747_v47 }
 0x29c   : > { %1784 = vst.msk [vmem:[#allocation2 + $0x100] sm:$0xff] %vm1210_vm10, %v1748_v56  ;;  %1785 = vst.msk [vmem:[#allocation2 + $0x108] sm:$0xff] %vm1210_vm10, %v1749_v42 }
 0x29d   : > { %1786 = vst.msk [vmem:[#allocation2 + $0x110] sm:$0xff] %vm1210_vm10, %v1750_v51  ;;  %1787 = vst.msk [vmem:[#allocation2 + $0x118] sm:$0xff] %vm1210_vm10, %v1751_v63 }
 0x29e PF: > { %p2100_p11 = scmp.ne.s32.totalorder %s2314_s12, 2 }
 0x29f   : > { %v3808_v40 = vld [vmem:[%s3941_s2] ss:$0 sm:$0xff] (!%p2100_p11)  ;;  %v1805_v30 = vld [vmem:[#allocation2 + $0x68] sm:$0xff] (!%p2100_p11)  ;;  %v1806_v4 = vld [vmem:[#allocation2 + $0x70] sm:$0xff] (!%p2100_p11) }
 0x2a0   : > { %1791 = sbr.rel (%p2100_p11) target bundleno = 695 (0x2b7), region = 44  ;;  %v1792_v58 = vld [vmem:[#allocation2] sm:$0xff] (!%p2100_p11)  ;;  %v1793_v29 = vld [vmem:[#allocation2 + $0x8] sm:$0xff] (!%p2100_p11)  ;;  %v1807_v0 = vld [vmem:[#allocation2 + $0x78] sm:$0xff] (!%p2100_p11)  ;;  %v1848_v3 = vadd.f32 (!%p2100_p11), %v3808_v40, %v1805_v30  ;;  %v1849_v53 = vadd.f32 (!%p2100_p11), %v3808_v40, %v1806_v4 }
 0x2a1   : > { %v1835_v28 = vadd.f32 (!%p2100_p11), %v3808_v40, %v1792_v58  ;;  %v1836_v21 = vadd.f32 (!%p2100_p11), %v3808_v40, %v1793_v29  ;;  %v1794_v60 = vld [vmem:[#allocation2 + $0x10] sm:$0xff] (!%p2100_p11)  ;;  %v1795_v9 = vld [vmem:[#allocation2 + $0x18] sm:$0xff] (!%p2100_p11)  ;;  %v1804_v23 = vld [vmem:[#allocation2 + $0x60] sm:$0xff] (!%p2100_p11)  ;;  %v1850_v16 = vadd.f32 (!%p2100_p11), %v3808_v40, %v1807_v0 }
 0x2a2   : > { %v1796_v27 = vld [vmem:[#allocation2 + $0x20] sm:$0xff] (!%p2100_p11)  ;;  %v1837_v39 = vadd.f32 (!%p2100_p11), %v3808_v40, %v1794_v60  ;;  %v1838_v11 = vadd.f32 (!%p2100_p11), %v3808_v40, %v1795_v9  ;;  %v1797_v20 = vld [vmem:[#allocation2 + $0x28] sm:$0xff] (!%p2100_p11)  ;;  %v1847_v34 = vadd.f32 (!%p2100_p11), %v3808_v40, %v1804_v23  ;;  %v1810_v2 = vld [vmem:[#allocation2 + $0x90] sm:$0xff] (!%p2100_p11)  ;;  %v1884_v33 = vmax.f32 (!%p2100_p11), %v1848_v3, 0.0 }
 0x2a3   : > { %v1839_v38 = vadd.f32 (!%p2100_p11), %v3808_v40, %v1796_v27  ;;  %v1798_v15 = vld [vmem:[#allocation2 + $0x30] sm:$0xff] (!%p2100_p11)  ;;  %v1799_v52 = vld [vmem:[#allocation2 + $0x38] sm:$0xff] (!%p2100_p11)  ;;  %v1871_v49 = vmax.f32 (!%p2100_p11), %v1835_v28, 0.0  ;;  %v1872_v48 = vmax.f32 (!%p2100_p11), %v1836_v21, 0.0  ;;  %v1840_v1 = vadd.f32 (!%p2100_p11), %v3808_v40, %v1797_v20  ;;  %v1808_v10 = vld [vmem:[#allocation2 + $0x80] sm:$0xff] (!%p2100_p11) }
 0x2a4   : > { %v1841_v17 = vadd.f32 (!%p2100_p11), %v3808_v40, %v1798_v15  ;;  %v1800_v55 = vld [vmem:[#allocation2 + $0x40] sm:$0xff] (!%p2100_p11)  ;;  %v1801_v59 = vld [vmem:[#allocation2 + $0x48] sm:$0xff] (!%p2100_p11)  ;;  %v1873_v44 = vmax.f32 (!%p2100_p11), %v1837_v39, 0.0  ;;  %v1874_v26 = vmax.f32 (!%p2100_p11), %v1838_v11, 0.0  ;;  %v1842_v8 = vadd.f32 (!%p2100_p11), %v3808_v40, %v1799_v52  ;;  %v1811_v35 = vld [vmem:[#allocation2 + $0x98] sm:$0xff] (!%p2100_p11)  ;;  %1920 = vst.msk [vmem:[%s2427_s9 + $0x68] sm:$0xff] (!%p2100_p11), %vm1210_vm10, %v1884_v33 }
 0x2a5   : > { %v1802_v22 = vld [vmem:[#allocation2 + $0x50] sm:$0xff] (!%p2100_p11)  ;;  %v1875_v19 = vmax.f32 (!%p2100_p11), %v1839_v38, 0.0  ;;  %v1803_v43 = vld [vmem:[#allocation2 + $0x58] sm:$0xff] (!%p2100_p11)  ;;  %1907 = vst.msk [vmem:[%s2427_s9] sm:$0xff] (!%p2100_p11), %vm1210_vm10, %v1871_v49  ;;  %1908 = vst.msk [vmem:[%s2427_s9 + $0x8] sm:$0xff] (!%p2100_p11), %vm1210_vm10, %v1872_v48  ;;  %v1876_v32 = vmax.f32 (!%p2100_p11), %v1840_v1, 0.0  ;;  %v1843_v61 = vadd.f32 (!%p2100_p11), %v3808_v40, %v1800_v55  ;;  %v1844_v45 = vadd.f32 (!%p2100_p11), %v3808_v40, %v1801_v59 }
 0x2a6   : > { %v1877_v6 = vmax.f32 (!%p2100_p11), %v1841_v17, 0.0  ;;  %1909 = vst.msk [vmem:[%s2427_s9 + $0x10] sm:$0xff] (!%p2100_p11), %vm1210_vm10, %v1873_v44  ;;  %1910 = vst.msk [vmem:[%s2427_s9 + $0x18] sm:$0xff] (!%p2100_p11), %vm1210_vm10, %v1874_v26  ;;  %v1878_v7 = vmax.f32 (!%p2100_p11), %v1842_v8, 0.0  ;;  %v1845_v57 = vadd.f32 (!%p2100_p11), %v3808_v40, %v1802_v22  ;;  %v1846_v24 = vadd.f32 (!%p2100_p11), %v3808_v40, %v1803_v43  ;;  %v1809_v12 = vld [vmem:[#allocation2 + $0x88] sm:$0xff] (!%p2100_p11)  ;;  %v1812_v37 = vld [vmem:[#allocation2 + $0xa0] sm:$0xff] (!%p2100_p11) }
 0x2a7   : > { %1911 = vst.msk [vmem:[%s2427_s9 + $0x20] sm:$0xff] %vm1210_vm10, %v1875_v19  ;;  %1912 = vst.msk [vmem:[%s2427_s9 + $0x28] sm:$0xff] %vm1210_vm10, %v1876_v32  ;;  %v1879_v13 = vmax.f32 %v1843_v61, 0.0  ;;  %v1880_v5 = vmax.f32 %v1844_v45, 0.0  ;;  %v1883_v54 = vmax.f32 %v1847_v34, 0.0  ;;  %v1813_v18 = vld [vmem:[#allocation2 + $0xa8] sm:$0xff]  ;;  %v1851_v31 = vadd.f32 %v3808_v40, %v1808_v10 }
 0x2a8   : > { %1913 = vst.msk [vmem:[%s2427_s9 + $0x30] sm:$0xff] %vm1210_vm10, %v1877_v6  ;;  %1914 = vst.msk [vmem:[%s2427_s9 + $0x38] sm:$0xff] %vm1210_vm10, %v1878_v7  ;;  %v1881_v50 = vmax.f32 %v1845_v57, 0.0  ;;  %v1882_v14 = vmax.f32 %v1846_v24, 0.0  ;;  %v1814_v36 = vld [vmem:[#allocation2 + $0xb0] sm:$0xff]  ;;  %v1885_v46 = vmax.f32 %v1849_v53, 0.0  ;;  %v1852_v47 = vadd.f32 %v3808_v40, %v1809_v12 }
 0x2a9   : > { %1915 = vst.msk [vmem:[%s2427_s9 + $0x40] sm:$0xff] %vm1210_vm10, %v1879_v13  ;;  %1916 = vst.msk [vmem:[%s2427_s9 + $0x48] sm:$0xff] %vm1210_vm10, %v1880_v5  ;;  %v1815_v56 = vld [vmem:[#allocation2 + $0xb8] sm:$0xff]  ;;  %v1886_v62 = vmax.f32 %v1850_v16, 0.0  ;;  %v1853_v41 = vadd.f32 %v3808_v40, %v1810_v2  ;;  %v1854_v25 = vadd.f32 %v3808_v40, %v1811_v35  ;;  %v1855_v42 = vadd.f32 %v3808_v40, %v1812_v37  ;;  %v1816_v51 = vld [vmem:[#allocation2 + $0xc0] sm:$0xff] }
 0x2aa   : > { %1917 = vst.msk [vmem:[%s2427_s9 + $0x50] sm:$0xff] %vm1210_vm10, %v1881_v50  ;;  %1918 = vst.msk [vmem:[%s2427_s9 + $0x58] sm:$0xff] %vm1210_vm10, %v1882_v14  ;;  %v1817_v63 = vld [vmem:[#allocation2 + $0xc8] sm:$0xff]  ;;  %v1887_v58 = vmax.f32 %v1851_v31, 0.0  ;;  %v1888_v29 = vmax.f32 %v1852_v47, 0.0  ;;  %v1856_v28 = vadd.f32 %v3808_v40, %v1813_v18  ;;  %v1857_v21 = vadd.f32 %v3808_v40, %v1814_v36  ;;  %v1818_v60 = vld [vmem:[#allocation2 + $0xd0] sm:$0xff] }
 0x2ab   : > { %1919 = vst.msk [vmem:[%s2427_s9 + $0x60] sm:$0xff] %vm1210_vm10, %v1883_v54  ;;  %1921 = vst.msk [vmem:[%s2427_s9 + $0x70] sm:$0xff] %vm1210_vm10, %v1885_v46  ;;  %v1819_v9 = vld [vmem:[#allocation2 + $0xd8] sm:$0xff]  ;;  %v1820_v27 = vld [vmem:[#allocation2 + $0xe0] sm:$0xff]  ;;  %v1889_v39 = vmax.f32 %v1853_v41, 0.0  ;;  %v1890_v11 = vmax.f32 %v1854_v25, 0.0  ;;  %v1858_v20 = vadd.f32 %v3808_v40, %v1815_v56  ;;  %v1859_v1 = vadd.f32 %v3808_v40, %v1816_v51 }
 0x2ac   : > { %1922 = vst.msk [vmem:[%s2427_s9 + $0x78] sm:$0xff] %vm1210_vm10, %v1886_v62  ;;  %v1891_v38 = vmax.f32 %v1855_v42, 0.0  ;;  %v1821_v15 = vld [vmem:[#allocation2 + $0xe8] sm:$0xff]  ;;  %v1822_v52 = vld [vmem:[#allocation2 + $0xf0] sm:$0xff]  ;;  %1923 = vst.msk [vmem:[%s2427_s9 + $0x80] sm:$0xff] %vm1210_vm10, %v1887_v58  ;;  %v1892_v49 = vmax.f32 %v1856_v28, 0.0  ;;  %v1860_v17 = vadd.f32 %v3808_v40, %v1817_v63  ;;  %v1861_v22 = vadd.f32 %v3808_v40, %v1818_v60 }
 0x2ad   : > { %1924 = vst.msk [vmem:[%s2427_s9 + $0x88] sm:$0xff] %vm1210_vm10, %v1888_v29  ;;  %v1893_v48 = vmax.f32 %v1857_v21, 0.0  ;;  %v1823_v55 = vld [vmem:[#allocation2 + $0xf8] sm:$0xff]  ;;  %1925 = vst.msk [vmem:[%s2427_s9 + $0x90] sm:$0xff] %vm1210_vm10, %v1889_v39  ;;  %v1894_v59 = vmax.f32 %v1858_v20, 0.0  ;;  %v1862_v44 = vadd.f32 %v3808_v40, %v1819_v9  ;;  %v1863_v26 = vadd.f32 %v3808_v40, %v1820_v27  ;;  %v1824_v19 = vld [vmem:[#allocation2 + $0x100] sm:$0xff] }
 0x2ae   : > { %1926 = vst.msk [vmem:[%s2427_s9 + $0x98] sm:$0xff] %vm1210_vm10, %v1890_v11  ;;  %1927 = vst.msk [vmem:[%s2427_s9 + $0xa0] sm:$0xff] %vm1210_vm10, %v1891_v38  ;;  %v1825_v8 = vld [vmem:[#allocation2 + $0x108] sm:$0xff]  ;;  %v1895_v43 = vmax.f32 %v1859_v1, 0.0  ;;  %v1896_v23 = vmax.f32 %v1860_v17, 0.0  ;;  %v1864_v30 = vadd.f32 %v3808_v40, %v1821_v15  ;;  %v1865_v32 = vadd.f32 %v3808_v40, %v1822_v52  ;;  %v1826_v6 = vld [vmem:[#allocation2 + $0x110] sm:$0xff] }
 0x2af   : > { %1928 = vst.msk [vmem:[%s2427_s9 + $0xa8] sm:$0xff] %vm1210_vm10, %v1892_v49  ;;  %1929 = vst.msk [vmem:[%s2427_s9 + $0xb0] sm:$0xff] %vm1210_vm10, %v1893_v48  ;;  %v1827_v61 = vld [vmem:[#allocation2 + $0x118] sm:$0xff]  ;;  %v1897_v45 = vmax.f32 %v1861_v22, 0.0  ;;  %v1898_v4 = vmax.f32 %v1862_v44, 0.0  ;;  %v1899_v0 = vmax.f32 %v1863_v26, 0.0  ;;  %v1866_v7 = vadd.f32 %v3808_v40, %v1823_v55 }
 0x2b0   : > { %1930 = vst.msk [vmem:[%s2427_s9 + $0xb8] sm:$0xff] %vm1210_vm10, %v1894_v59  ;;  %1931 = vst.msk [vmem:[%s2427_s9 + $0xc0] sm:$0xff] %vm1210_vm10, %v1895_v43  ;;  %v1900_v57 = vmax.f32 %v1864_v30, 0.0  ;;  %v1901_v24 = vmax.f32 %v1865_v32, 0.0  ;;  %v1867_v34 = vadd.f32 %v3808_v40, %v1824_v19  ;;  %v1868_v10 = vadd.f32 %v3808_v40, %v1825_v8 }
 0x2b1   : > { %1932 = vst.msk [vmem:[%s2427_s9 + $0xc8] sm:$0xff] %vm1210_vm10, %v1896_v23  ;;  %1933 = vst.msk [vmem:[%s2427_s9 + $0xd0] sm:$0xff] %vm1210_vm10, %v1897_v45  ;;  %v1902_v12 = vmax.f32 %v1866_v7, 0.0  ;;  %v1869_v13 = vadd.f32 %v3808_v40, %v1826_v6  ;;  %v1870_v5 = vadd.f32 %v3808_v40, %v1827_v61 }
 0x2b2   : > { %1934 = vst.msk [vmem:[%s2427_s9 + $0xd8] sm:$0xff] %vm1210_vm10, %v1898_v4  ;;  %1935 = vst.msk [vmem:[%s2427_s9 + $0xe0] sm:$0xff] %vm1210_vm10, %v1899_v0  ;;  %v1903_v3 = vmax.f32 %v1867_v34, 0.0  ;;  %v1904_v53 = vmax.f32 %v1868_v10, 0.0 }
 0x2b3   : > { %1936 = vst.msk [vmem:[%s2427_s9 + $0xe8] sm:$0xff] %vm1210_vm10, %v1900_v57  ;;  %1937 = vst.msk [vmem:[%s2427_s9 + $0xf0] sm:$0xff] %vm1210_vm10, %v1901_v24  ;;  %v1905_v2 = vmax.f32 %v1869_v13, 0.0  ;;  %v1906_v35 = vmax.f32 %v1870_v5, 0.0 }
 0x2b4   : > { %1938 = vst.msk [vmem:[%s2427_s9 + $0xf8] sm:$0xff] %vm1210_vm10, %v1902_v12  ;;  %1939 = vst.msk [vmem:[%s2427_s9 + $0x100] sm:$0xff] %vm1210_vm10, %v1903_v3 }
 0x2b5   : > { %1940 = vst.msk [vmem:[%s2427_s9 + $0x108] sm:$0xff] %vm1210_vm10, %v1904_v53  ;;  %1941 = vst.msk [vmem:[%s2427_s9 + $0x110] sm:$0xff] %vm1210_vm10, %v1905_v2 }
 0x2b6   : > { %1942 = vst.msk [vmem:[%s2427_s9 + $0x118] sm:$0xff] %vm1210_vm10, %v1906_v35 }
 0x2b7 PF: > { %s13_s18 = sadd.s32 1, %s2338_s18   ;;  %s4003_s12 = smov %s2326_s15 }
 0x2b8   : > { %p10_p12 = scmp.ge.s32.totalorder %s13_s18, 98   ;;  %s4004_s13 = smov %s2330_s16 }
 0x2b9   : > { %s4005_s14 = smov %s2334_s17  ;;  %s4006_s15 = smov %s4010_s19 }
 0x2ba   : > { %s4007_s16 = smov %s4014_s20  ;;  %s4008_s17 = smov %s4018_s21 }
 0x2bb   :  { %12 = sbr.rel (!%p10_p12) target bundleno = 4 (0x4), region = 75 }

</bundles_post_ra>
